<compile_context>
chip_gen: v7x
topology: tpu7x:2x2x1
jax: 0.10.0
libtpu: 0.0.40
codegen_flags: <defaults>
</compile_context>

<pallas_src>
import functools

import jax
import jax.numpy as jnp
from jax import lax
from jax.experimental import pallas as pl
from jax.experimental.pallas import tpu as pltpu


# ------------------------------ fused Pallas kernel -------------------------------

def _fused_encoder_kernel(
    x_ref,
    wt_e_ref, wt_o_ref, wp_e_ref, wp_o_ref, wg_e_ref, wg_o_ref,
    wo_e_ref, wo_o_ref,
    cw0_ref, cb0_ref, cw1_ref, cb1_ref, cw2_ref, cb2_ref, cw3_ref, cb3_ref,
    gamma_ref,
    o_ref,
    *, width, n_tap):
    """One batch element per grid step; everything VMEM-resident."""
    f32 = jnp.float32
    W = width
    W2, W4 = W // 2, W // 4

    x = x_ref[0]                                                     # (C, W)

    def dot(a, b):
        return jnp.dot(a, b, preferred_element_type=f32)

    # ---- spectral-normed 1x1 conv projections; even/odd channel rows pre-split on host
    theta_e = dot(wt_e_ref[...], x)                                  # (C/16, W)
    theta_o = dot(wt_o_ref[...], x)                                  # (C/16, W)
    phimax = jnp.maximum(dot(wp_e_ref[...], x), dot(wp_o_ref[...], x))   # (C/16, W)
    gmax = jnp.maximum(dot(wg_e_ref[...], x), dot(wg_o_ref[...], x))     # (C/4,  W)

    # ---- MaxPool2d(2,2) over (channel,width) + .view: the channel-pair max is the
    #      jnp.maximum above; the width-pair max + left/right-half split is expressed as
    #      max of column-selection matmuls (constant iota-built matrices, no reshapes).
    r = lax.broadcasted_iota(jnp.int32, (W, W4), 0)
    c = lax.broadcasted_iota(jnp.int32, (W, W4), 1)

    def sel(off):
        return jnp.where(r == 2 * c + off, 1.0, 0.0).astype(f32)    # (W, W/4)

    sl0, sl1, sr0, sr1 = sel(0), sel(1), sel(W2), sel(W2 + 1)

    def pool_lr(t):
        left = jnp.maximum(dot(t, sl0), dot(t, sl1))                 # pooled[:, :W/4]
        right = jnp.maximum(dot(t, sr0), dot(t, sr1))                # pooled[:, W/4:]
        return left, right

    phi_l, phi_r = pool_lr(phimax)                                   # (C/16, W/4) each
    g_l, g_r = pool_lr(gmax)                                         # (C/4,  W/4) each

    # ---- attention scores: bmm(theta^T, phi_pooled_viewed), softmax over keys
    s = (lax.dot_general(theta_e, phi_l, (((0,), (0,)), ((), ())),
                         preferred_element_type=f32)
         + lax.dot_general(theta_o, phi_r, (((0,), (0,)), ((), ())),
                           preferred_element_type=f32))              # (W, W/4)
    s = s - jnp.max(s, axis=-1, keepdims=True)
    e = jnp.exp(s)
    attn = e * pl.reciprocal(jnp.sum(e, axis=-1, keepdims=True), approx=True)

    # ---- attn_g = bmm(g_pooled_viewed, attn^T); output 1x1 conv (even/odd cols split)
    ag_e = lax.dot_general(g_l, attn, (((1,), (1,)), ((), ())),
                           preferred_element_type=f32)               # (C/4, W)
    ag_o = lax.dot_general(g_r, attn, (((1,), (1,)), ((), ())),
                           preferred_element_type=f32)               # (C/4, W)
    ago = dot(wo_e_ref[...], ag_e) + dot(wo_o_ref[...], ag_o)        # (C, W)

    # ---- self_attn(x) = x + gamma*ago ; encoder adds src again (dropout = identity)
    h = 2.0 * x + gamma_ref[0] * ago                                 # (C, W)

    # ---- conv chain: Conv1d(k, pad=k//2)+ReLU x4, halo via constant shift matrices
    pad = n_tap // 2
    ar = lax.broadcasted_iota(jnp.int32, (W, W), 0)
    ac = lax.broadcasted_iota(jnp.int32, (W, W), 1)
    shift = {off: jnp.where(ar == ac + off, 1.0, 0.0).astype(f32)
             for off in range(-pad, pad + 1) if off != 0}

    def conv_relu(hin, w_ref, b_ref):
        acc = b_ref[...]                                             # (Cout, 1) bcast
        for k in range(n_tap):                                       # static unroll
            off = k - pad
            hk = hin if off == 0 else dot(hin, shift[off])           # col j -> x[:, j+off]
            acc = acc + dot(w_ref[k], hk)
        return jnp.maximum(acc, 0.0)

    h = conv_relu(h, cw0_ref, cb0_ref)
    h = conv_relu(h, cw1_ref, cb1_ref)
    h = conv_relu(h, cw2_ref, cb2_ref)
    h = conv_relu(h, cw3_ref, cb3_ref)

    # ---- final residual (mutate(src) + residual)
    o_ref[0] = h + x


# --------------------------------- host wrapper -----------------------------------

def transformer_encoder_layer(src, params):
    B, C, W = src.shape
    assert C % 16 == 0 and W % 4 == 0, "channels % 16 == 0 and width % 4 == 0 required"
    assert len(params["conv"]) == 4
    K = params["conv"][0][0].shape[2]

    # One-time parameter preprocessing (hoisted out of the kernel path).
    wt, wp, wg, wo = params["wt"], params["wp"], params["wg"], params["wo"]
    weight_args = [
        wt[0::2], wt[1::2],            # theta even/odd rows   (C/16, C)
        wp[0::2], wp[1::2],            # phi even/odd rows     (C/16, C)
        wg[0::2], wg[1::2],            # g even/odd rows       (C/4,  C)
        wo[:, 0::2], wo[:, 1::2],      # o_conv even/odd cols  (C,    C/4)
    ]
    for (w, b) in params["conv"]:
        weight_args.append(jnp.transpose(w, (2, 0, 1)))              # (K, Cout, Cin)
        weight_args.append(b.reshape(-1, 1))                         # (Cout, 1)
    gamma = params["gamma"].reshape(1).astype(jnp.float32)

    def full(a):
        nd = a.ndim
        return pl.BlockSpec(a.shape, lambda i, _nd=nd: (0,) * _nd)

    in_specs = [pl.BlockSpec((1, C, W), lambda i: (i, 0, 0))]
    in_specs += [full(a) for a in weight_args]
    in_specs.append(pl.BlockSpec(memory_space=pltpu.MemorySpace.SMEM))   # gamma scalar

    kernel = functools.partial(_fused_encoder_kernel, width=W, n_tap=K)
    return pl.pallas_call(
        kernel,
        out_shape=jax.ShapeDtypeStruct((B, C, W), jnp.float32),
        grid=(B,),
        in_specs=in_specs,
        out_specs=pl.BlockSpec((1, C, W), lambda i: (i, 0, 0)),
        compiler_params=pltpu.CompilerParams(
            dimension_semantics=("parallel",),        # shards batch across TCs on v7x
            vmem_limit_bytes=32 * 1024 * 1024,
        ),
    )(src, *weight_args, gamma)


# ------------------------------ reference (pure JAX) -------------------------------

def _maxpool2d_on_3d_then_view(t, c_view, w_view):
    """nn.MaxPool2d(2,2) applied to a 3-D tensor (treated as (C,H,W)) + .view (glue)."""
    b, c, w = t.shape
    p = t.reshape(b, c // 2, 2, w // 2, 2).max(axis=(2, 4))
    return p.reshape(b, c_view, w_view)


def reference_forward(x, p):
    def conv1x1(w2d, t):
        return jnp.einsum("oi,biw->bow", w2d, t)

    B, C, W = x.shape
    theta = conv1x1(p["wt"], x)
    phi = conv1x1(p["wp"], x)
    g = conv1x1(p["wg"], x)
    phi_p = _maxpool2d_on_3d_then_view(phi, C // 8, W // 4)
    g_p = _maxpool2d_on_3d_then_view(g, C // 2, W // 4)
    attn = jax.nn.softmax(jnp.einsum("bcq,bck->bqk", theta, phi_p), axis=-1)
    ag = jnp.einsum("bck,bqk->bcq", g_p, attn)
    ago = conv1x1(p["wo"], ag)
    src2 = x + p["gamma"].reshape(()) * ago
    src = x + src2

    def conv_block_ref(t, w, b):
        pad = w.shape[2] // 2
        tp = jnp.pad(t, ((0, 0), (0, 0), (pad, pad)))
        y = b[None, :, None]
        Wd = t.shape[2]
        for k in range(w.shape[2]):
            y = y + jnp.einsum("oi,biw->bow", w[:, :, k], tp[:, :, k:k + Wd])
        return jnp.maximum(y, 0.0)

    h = src
    for (w, b) in p["conv"]:
        h = conv_block_ref(h, w, b)
    return h + x


# -------------------------------------- main ---------------------------------------

def spectral_normalize(w2d, eps=1e-12):
    sigma = jnp.linalg.svd(w2d, compute_uv=False)[0]
    return w2d / (sigma + eps)


if __name__ == "__main__":
    B, C, W = 2, 16, 16          # channels % 16 == 0 and width % 4 == 0 required
    key = jax.random.PRNGKey(0)
    ks = jax.random.split(key, 12)

    x = jax.random.normal(ks[0], (B, C, W), jnp.float32)

    def rnd(k, shape, fan_in):
        return jax.random.normal(k, shape, jnp.float32) / jnp.sqrt(float(fan_in))

    # NonLocalSelfAttention 1x1 conv weights (bias=False), spectrally normalized.
    wt = spectral_normalize(rnd(ks[1], (C // 8, C), C))
    wp = spectral_normalize(rnd(ks[2], (C // 8, C), C))
    wg = spectral_normalize(rnd(ks[3], (C // 2, C), C))
    wo = spectral_normalize(rnd(ks[4], (C, C // 2), C // 2))
    # gamma is nn.Parameter(torch.zeros(1)); use a nonzero deterministic value so the
    # attention branch actually contributes in this synthetic test.
    gamma = jnp.array([0.1], jnp.float32)

    # mutate: ConvolutionalBlock x4, channels C -> C/2 -> C/2 -> C/2 -> C, k=3, pad=1
    K = 3
    oc = C // 2
    conv_shapes = [(oc, C), (oc, oc), (oc, oc), (C, oc)]
    conv = []
    for i, (co, ci) in enumerate(conv_shapes):
        w = rnd(ks[5 + i], (co, ci, K), ci * K)
        b = 0.01 * jnp.arange(co, dtype=jnp.float32)
        conv.append((w, b))

    params = dict(wt=wt, wp=wp, wg=wg, wo=wo, gamma=gamma, conv=conv)

    out = transformer_encoder_layer(x, params)
    out = jax.block_until_ready(out)

    ref = reference_forward(x, params)
    assert out.shape == (B, C, W)
    err = float(jnp.max(jnp.abs(out - ref)))
    assert jnp.allclose(out, ref, atol=2e-2, rtol=2e-2), err

    print("KERNEL_OK")
</pallas_src>

<mosaic_0001>
module attributes {stable_mosaic.version = 11 : i64} {
  func.func @_fused_encoder_kernel(%arg0: i32, %arg1: memref<1x16x16xf32, #tpu.memory_space<vmem>>, %arg2: memref<1x16xf32, #tpu.memory_space<vmem>>, %arg3: memref<1x16xf32, #tpu.memory_space<vmem>>, %arg4: memref<1x16xf32, #tpu.memory_space<vmem>>, %arg5: memref<1x16xf32, #tpu.memory_space<vmem>>, %arg6: memref<4x16xf32, #tpu.memory_space<vmem>>, %arg7: memref<4x16xf32, #tpu.memory_space<vmem>>, %arg8: memref<16x4xf32, #tpu.memory_space<vmem>>, %arg9: memref<16x4xf32, #tpu.memory_space<vmem>>, %arg10: memref<3x8x16xf32, #tpu.memory_space<vmem>>, %arg11: memref<8x1xf32, #tpu.memory_space<vmem>>, %arg12: memref<3x8x8xf32, #tpu.memory_space<vmem>>, %arg13: memref<8x1xf32, #tpu.memory_space<vmem>>, %arg14: memref<3x8x8xf32, #tpu.memory_space<vmem>>, %arg15: memref<8x1xf32, #tpu.memory_space<vmem>>, %arg16: memref<3x16x8xf32, #tpu.memory_space<vmem>>, %arg17: memref<16x1xf32, #tpu.memory_space<vmem>>, %arg18: memref<1xf32, #tpu.memory_space<smem>>, %arg19: memref<1x16x16xf32, #tpu.memory_space<vmem>>) attributes {dimension_semantics = [#tpu.dimension_semantics<parallel>], iteration_bounds = array<i64: 2>, scalar_prefetch = 0 : i64, scratch_operands = 0 : i64, tpu.core_type = #tpu.core_type<tc>, window_params = [{transform_indices = @transform_0, window_bounds = array<i64: 1, 16, 16>}, {pipeline_mode = #tpu.pipeline_mode<synchronous>, transform_indices = @transform_1, window_bounds = array<i64: 1, 16>}, {pipeline_mode = #tpu.pipeline_mode<synchronous>, transform_indices = @transform_2, window_bounds = array<i64: 1, 16>}, {pipeline_mode = #tpu.pipeline_mode<synchronous>, transform_indices = @transform_3, window_bounds = array<i64: 1, 16>}, {pipeline_mode = #tpu.pipeline_mode<synchronous>, transform_indices = @transform_4, window_bounds = array<i64: 1, 16>}, {pipeline_mode = #tpu.pipeline_mode<synchronous>, transform_indices = @transform_5, window_bounds = array<i64: 4, 16>}, {pipeline_mode = #tpu.pipeline_mode<synchronous>, transform_indices = @transform_6, window_bounds = array<i64: 4, 16>}, {pipeline_mode = #tpu.pipeline_mode<synchronous>, transform_indices = @transform_7, window_bounds = array<i64: 16, 4>}, {pipeline_mode = #tpu.pipeline_mode<synchronous>, transform_indices = @transform_8, window_bounds = array<i64: 16, 4>}, {pipeline_mode = #tpu.pipeline_mode<synchronous>, transform_indices = @transform_9, window_bounds = array<i64: 3, 8, 16>}, {pipeline_mode = #tpu.pipeline_mode<synchronous>, transform_indices = @transform_10, window_bounds = array<i64: 8, 1>}, {pipeline_mode = #tpu.pipeline_mode<synchronous>, transform_indices = @transform_11, window_bounds = array<i64: 3, 8, 8>}, {pipeline_mode = #tpu.pipeline_mode<synchronous>, transform_indices = @transform_12, window_bounds = array<i64: 8, 1>}, {pipeline_mode = #tpu.pipeline_mode<synchronous>, transform_indices = @transform_13, window_bounds = array<i64: 3, 8, 8>}, {pipeline_mode = #tpu.pipeline_mode<synchronous>, transform_indices = @transform_14, window_bounds = array<i64: 8, 1>}, {pipeline_mode = #tpu.pipeline_mode<synchronous>, transform_indices = @transform_15, window_bounds = array<i64: 3, 16, 8>}, {pipeline_mode = #tpu.pipeline_mode<synchronous>, transform_indices = @transform_16, window_bounds = array<i64: 16, 1>}, {transform_indices = @transform_17, window_bounds = array<i64: 1>}, {transform_indices = @transform_18, window_bounds = array<i64: 1, 16, 16>}]} {
    %c0 = arith.constant 0 : index
    %c0_0 = arith.constant 0 : index
    %c0_1 = arith.constant 0 : index
    %0 = vector.load %arg1[%c0, %c0_0, %c0_1] : memref<1x16x16xf32, #tpu.memory_space<vmem>>, vector<1x16x16xf32>
    %1 = vector.shape_cast %0 : vector<1x16x16xf32> to vector<16x16xf32>
    %c0_2 = arith.constant 0 : index
    %c0_3 = arith.constant 0 : index
    %2 = vector.load %arg2[%c0_2, %c0_3] : memref<1x16xf32, #tpu.memory_space<vmem>>, vector<1x16xf32>
    %cst = arith.constant dense<0.000000e+00> : vector<1x16xf32>
    %3 = tpu.matmul %2, %1, %cst {dimension_numbers = #tpu.dot_dimension_numbers<[1], [0], [0], [1], [0, 0, 1, 1], [], []>} : vector<1x16xf32>, vector<16x16xf32>, vector<1x16xf32> -> vector<1x16xf32>
    %c0_4 = arith.constant 0 : index
    %c0_5 = arith.constant 0 : index
    %4 = vector.load %arg3[%c0_4, %c0_5] : memref<1x16xf32, #tpu.memory_space<vmem>>, vector<1x16xf32>
    %cst_6 = arith.constant dense<0.000000e+00> : vector<1x16xf32>
    %5 = tpu.matmul %4, %1, %cst_6 {dimension_numbers = #tpu.dot_dimension_numbers<[1], [0], [0], [1], [0, 0, 1, 1], [], []>} : vector<1x16xf32>, vector<16x16xf32>, vector<1x16xf32> -> vector<1x16xf32>
    %c0_7 = arith.constant 0 : index
    %c0_8 = arith.constant 0 : index
    %6 = vector.load %arg4[%c0_7, %c0_8] : memref<1x16xf32, #tpu.memory_space<vmem>>, vector<1x16xf32>
    %cst_9 = arith.constant dense<0.000000e+00> : vector<1x16xf32>
    %7 = tpu.matmul %6, %1, %cst_9 {dimension_numbers = #tpu.dot_dimension_numbers<[1], [0], [0], [1], [0, 0, 1, 1], [], []>} : vector<1x16xf32>, vector<16x16xf32>, vector<1x16xf32> -> vector<1x16xf32>
    %c0_10 = arith.constant 0 : index
    %c0_11 = arith.constant 0 : index
    %8 = vector.load %arg5[%c0_10, %c0_11] : memref<1x16xf32, #tpu.memory_space<vmem>>, vector<1x16xf32>
    %cst_12 = arith.constant dense<0.000000e+00> : vector<1x16xf32>
    %9 = tpu.matmul %8, %1, %cst_12 {dimension_numbers = #tpu.dot_dimension_numbers<[1], [0], [0], [1], [0, 0, 1, 1], [], []>} : vector<1x16xf32>, vector<16x16xf32>, vector<1x16xf32> -> vector<1x16xf32>
    %10 = arith.maximumf %7, %9 : vector<1x16xf32>
    %c0_13 = arith.constant 0 : index
    %c0_14 = arith.constant 0 : index
    %11 = vector.load %arg6[%c0_13, %c0_14] : memref<4x16xf32, #tpu.memory_space<vmem>>, vector<4x16xf32>
    %cst_15 = arith.constant dense<0.000000e+00> : vector<4x16xf32>
    %12 = tpu.matmul %11, %1, %cst_15 {dimension_numbers = #tpu.dot_dimension_numbers<[1], [0], [0], [1], [0, 0, 1, 1], [], []>} : vector<4x16xf32>, vector<16x16xf32>, vector<4x16xf32> -> vector<4x16xf32>
    %c0_16 = arith.constant 0 : index
    %c0_17 = arith.constant 0 : index
    %13 = vector.load %arg7[%c0_16, %c0_17] : memref<4x16xf32, #tpu.memory_space<vmem>>, vector<4x16xf32>
    %cst_18 = arith.constant dense<0.000000e+00> : vector<4x16xf32>
    %14 = tpu.matmul %13, %1, %cst_18 {dimension_numbers = #tpu.dot_dimension_numbers<[1], [0], [0], [1], [0, 0, 1, 1], [], []>} : vector<4x16xf32>, vector<16x16xf32>, vector<4x16xf32> -> vector<4x16xf32>
    %15 = arith.maximumf %12, %14 : vector<4x16xf32>
    %16 = tpu.iota {dimensions = array<i32: 0>} : vector<16x4xi32>
    %17 = tpu.iota {dimensions = array<i32: 1>} : vector<16x4xi32>
    %c2_i32 = arith.constant 2 : i32
    %18 = vector.broadcast %c2_i32 : i32 to vector<16x4xi32>
    %19 = arith.muli %18, %17 : vector<16x4xi32>
    %c0_i32 = arith.constant 0 : i32
    %20 = vector.broadcast %c0_i32 : i32 to vector<16x4xi32>
    %21 = arith.addi %19, %20 : vector<16x4xi32>
    %22 = arith.cmpi eq, %16, %21 : vector<16x4xi32>
    %cst_19 = arith.constant 1.000000e+00 : f32
    %cst_20 = arith.constant 0.000000e+00 : f32
    %23 = vector.broadcast %cst_19 : f32 to vector<16x4xf32>
    %24 = vector.broadcast %cst_20 : f32 to vector<16x4xf32>
    %25 = arith.select %22, %23, %24 : vector<16x4xi1>, vector<16x4xf32>
    %c2_i32_21 = arith.constant 2 : i32
    %26 = vector.broadcast %c2_i32_21 : i32 to vector<16x4xi32>
    %27 = arith.muli %26, %17 : vector<16x4xi32>
    %c1_i32 = arith.constant 1 : i32
    %28 = vector.broadcast %c1_i32 : i32 to vector<16x4xi32>
    %29 = arith.addi %27, %28 : vector<16x4xi32>
    %30 = arith.cmpi eq, %16, %29 : vector<16x4xi32>
    %cst_22 = arith.constant 1.000000e+00 : f32
    %cst_23 = arith.constant 0.000000e+00 : f32
    %31 = vector.broadcast %cst_22 : f32 to vector<16x4xf32>
    %32 = vector.broadcast %cst_23 : f32 to vector<16x4xf32>
    %33 = arith.select %30, %31, %32 : vector<16x4xi1>, vector<16x4xf32>
    %c2_i32_24 = arith.constant 2 : i32
    %34 = vector.broadcast %c2_i32_24 : i32 to vector<16x4xi32>
    %35 = arith.muli %34, %17 : vector<16x4xi32>
    %c8_i32 = arith.constant 8 : i32
    %36 = vector.broadcast %c8_i32 : i32 to vector<16x4xi32>
    %37 = arith.addi %35, %36 : vector<16x4xi32>
    %38 = arith.cmpi eq, %16, %37 : vector<16x4xi32>
    %cst_25 = arith.constant 1.000000e+00 : f32
    %cst_26 = arith.constant 0.000000e+00 : f32
    %39 = vector.broadcast %cst_25 : f32 to vector<16x4xf32>
    %40 = vector.broadcast %cst_26 : f32 to vector<16x4xf32>
    %41 = arith.select %38, %39, %40 : vector<16x4xi1>, vector<16x4xf32>
    %c2_i32_27 = arith.constant 2 : i32
    %42 = vector.broadcast %c2_i32_27 : i32 to vector<16x4xi32>
    %43 = arith.muli %42, %17 : vector<16x4xi32>
    %c9_i32 = arith.constant 9 : i32
    %44 = vector.broadcast %c9_i32 : i32 to vector<16x4xi32>
    %45 = arith.addi %43, %44 : vector<16x4xi32>
    %46 = arith.cmpi eq, %16, %45 : vector<16x4xi32>
    %cst_28 = arith.constant 1.000000e+00 : f32
    %cst_29 = arith.constant 0.000000e+00 : f32
    %47 = vector.broadcast %cst_28 : f32 to vector<16x4xf32>
    %48 = vector.broadcast %cst_29 : f32 to vector<16x4xf32>
    %49 = arith.select %46, %47, %48 : vector<16x4xi1>, vector<16x4xf32>
    %cst_30 = arith.constant dense<0.000000e+00> : vector<1x4xf32>
    %50 = tpu.matmul %10, %25, %cst_30 {dimension_numbers = #tpu.dot_dimension_numbers<[1], [0], [0], [1], [0, 0, 1, 1], [], []>} : vector<1x16xf32>, vector<16x4xf32>, vector<1x4xf32> -> vector<1x4xf32>
    %cst_31 = arith.constant dense<0.000000e+00> : vector<1x4xf32>
    %51 = tpu.matmul %10, %33, %cst_31 {dimension_numbers = #tpu.dot_dimension_numbers<[1], [0], [0], [1], [0, 0, 1, 1], [], []>} : vector<1x16xf32>, vector<16x4xf32>, vector<1x4xf32> -> vector<1x4xf32>
    %52 = arith.maximumf %50, %51 : vector<1x4xf32>
    %cst_32 = arith.constant dense<0.000000e+00> : vector<1x4xf32>
    %53 = tpu.matmul %10, %41, %cst_32 {dimension_numbers = #tpu.dot_dimension_numbers<[1], [0], [0], [1], [0, 0, 1, 1], [], []>} : vector<1x16xf32>, vector<16x4xf32>, vector<1x4xf32> -> vector<1x4xf32>
    %cst_33 = arith.constant dense<0.000000e+00> : vector<1x4xf32>
    %54 = tpu.matmul %10, %49, %cst_33 {dimension_numbers = #tpu.dot_dimension_numbers<[1], [0], [0], [1], [0, 0, 1, 1], [], []>} : vector<1x16xf32>, vector<16x4xf32>, vector<1x4xf32> -> vector<1x4xf32>
    %55 = arith.maximumf %53, %54 : vector<1x4xf32>
    %cst_34 = arith.constant dense<0.000000e+00> : vector<4x4xf32>
    %56 = tpu.matmul %15, %25, %cst_34 {dimension_numbers = #tpu.dot_dimension_numbers<[1], [0], [0], [1], [0, 0, 1, 1], [], []>} : vector<4x16xf32>, vector<16x4xf32>, vector<4x4xf32> -> vector<4x4xf32>
    %cst_35 = arith.constant dense<0.000000e+00> : vector<4x4xf32>
    %57 = tpu.matmul %15, %33, %cst_35 {dimension_numbers = #tpu.dot_dimension_numbers<[1], [0], [0], [1], [0, 0, 1, 1], [], []>} : vector<4x16xf32>, vector<16x4xf32>, vector<4x4xf32> -> vector<4x4xf32>
    %58 = arith.maximumf %56, %57 : vector<4x4xf32>
    %cst_36 = arith.constant dense<0.000000e+00> : vector<4x4xf32>
    %59 = tpu.matmul %15, %41, %cst_36 {dimension_numbers = #tpu.dot_dimension_numbers<[1], [0], [0], [1], [0, 0, 1, 1], [], []>} : vector<4x16xf32>, vector<16x4xf32>, vector<4x4xf32> -> vector<4x4xf32>
    %cst_37 = arith.constant dense<0.000000e+00> : vector<4x4xf32>
    %60 = tpu.matmul %15, %49, %cst_37 {dimension_numbers = #tpu.dot_dimension_numbers<[1], [0], [0], [1], [0, 0, 1, 1], [], []>} : vector<4x16xf32>, vector<16x4xf32>, vector<4x4xf32> -> vector<4x4xf32>
    %61 = arith.maximumf %59, %60 : vector<4x4xf32>
    %cst_38 = arith.constant dense<0.000000e+00> : vector<16x4xf32>
    %62 = tpu.matmul %3, %52, %cst_38 {dimension_numbers = #tpu.dot_dimension_numbers<[0], [0], [1], [1], [0, 1, 1, 1], [], []>} : vector<1x16xf32>, vector<1x4xf32>, vector<16x4xf32> -> vector<16x4xf32>
    %cst_39 = arith.constant dense<0.000000e+00> : vector<16x4xf32>
    %63 = tpu.matmul %5, %55, %cst_39 {dimension_numbers = #tpu.dot_dimension_numbers<[0], [0], [1], [1], [0, 1, 1, 1], [], []>} : vector<1x16xf32>, vector<1x4xf32>, vector<16x4xf32> -> vector<16x4xf32>
    %64 = arith.addf %62, %63 : vector<16x4xf32>
    %cst_40 = arith.constant dense<0xFF800000> : vector<16xf32>
    %65 = vector.multi_reduction <maximumf>, %64, %cst_40 [1] : vector<16x4xf32> to vector<16xf32>
    %66 = vector.shape_cast %65 : vector<16xf32> to vector<16x1xf32>
    %67 = vector.broadcast %66 : vector<16x1xf32> to vector<16x4xf32>
    %68 = arith.subf %64, %67 : vector<16x4xf32>
    %69 = math.exp %68 : vector<16x4xf32>
    %cst_41 = arith.constant dense<0.000000e+00> : vector<16xf32>
    %70 = vector.multi_reduction <add>, %69, %cst_41 [1] : vector<16x4xf32> to vector<16xf32>
    %71 = vector.shape_cast %70 : vector<16xf32> to vector<16x1xf32>
    %72 = tpu.reciprocal %71 {approx = true} : vector<16x1xf32> -> vector<16x1xf32>
    %73 = vector.broadcast %72 : vector<16x1xf32> to vector<16x4xf32>
    %74 = arith.mulf %69, %73 : vector<16x4xf32>
    %cst_42 = arith.constant dense<0.000000e+00> : vector<4x16xf32>
    %75 = tpu.matmul %58, %74, %cst_42 {dimension_numbers = #tpu.dot_dimension_numbers<[1], [1], [0], [0], [0, 0, 1, 0], [], []>} : vector<4x4xf32>, vector<16x4xf32>, vector<4x16xf32> -> vector<4x16xf32>
    %cst_43 = arith.constant dense<0.000000e+00> : vector<4x16xf32>
    %76 = tpu.matmul %61, %74, %cst_43 {dimension_numbers = #tpu.dot_dimension_numbers<[1], [1], [0], [0], [0, 0, 1, 0], [], []>} : vector<4x4xf32>, vector<16x4xf32>, vector<4x16xf32> -> vector<4x16xf32>
    %c0_44 = arith.constant 0 : index
    %c0_45 = arith.constant 0 : index
    %77 = vector.load %arg8[%c0_44, %c0_45] : memref<16x4xf32, #tpu.memory_space<vmem>>, vector<16x4xf32>
    %cst_46 = arith.constant dense<0.000000e+00> : vector<16x16xf32>
    %78 = tpu.matmul %77, %75, %cst_46 {dimension_numbers = #tpu.dot_dimension_numbers<[1], [0], [0], [1], [0, 0, 1, 1], [], []>} : vector<16x4xf32>, vector<4x16xf32>, vector<16x16xf32> -> vector<16x16xf32>
    %c0_47 = arith.constant 0 : index
    %c0_48 = arith.constant 0 : index
    %79 = vector.load %arg9[%c0_47, %c0_48] : memref<16x4xf32, #tpu.memory_space<vmem>>, vector<16x4xf32>
    %cst_49 = arith.constant dense<0.000000e+00> : vector<16x16xf32>
    %80 = tpu.matmul %79, %76, %cst_49 {dimension_numbers = #tpu.dot_dimension_numbers<[1], [0], [0], [1], [0, 0, 1, 1], [], []>} : vector<16x4xf32>, vector<4x16xf32>, vector<16x16xf32> -> vector<16x16xf32>
    %81 = arith.addf %78, %80 : vector<16x16xf32>
    %cst_50 = arith.constant 2.000000e+00 : f32
    %82 = vector.broadcast %cst_50 : f32 to vector<16x16xf32>
    %83 = arith.mulf %82, %1 : vector<16x16xf32>
    %c0_51 = arith.constant 0 : index
    %84 = memref.load %arg18[%c0_51] : memref<1xf32, #tpu.memory_space<smem>>
    %85 = vector.broadcast %84 : f32 to vector<16x16xf32>
    %86 = arith.mulf %85, %81 : vector<16x16xf32>
    %87 = arith.addf %83, %86 : vector<16x16xf32>
    %88 = tpu.iota {dimensions = array<i32: 0>} : vector<16x16xi32>
    %89 = tpu.iota {dimensions = array<i32: 1>} : vector<16x16xi32>
    %c-1_i32 = arith.constant -1 : i32
    %90 = vector.broadcast %c-1_i32 : i32 to vector<16x16xi32>
    %91 = arith.addi %89, %90 : vector<16x16xi32>
    %92 = arith.cmpi eq, %88, %91 : vector<16x16xi32>
    %cst_52 = arith.constant 1.000000e+00 : f32
    %cst_53 = arith.constant 0.000000e+00 : f32
    %93 = vector.broadcast %cst_52 : f32 to vector<16x16xf32>
    %94 = vector.broadcast %cst_53 : f32 to vector<16x16xf32>
    %95 = arith.select %92, %93, %94 : vector<16x16xi1>, vector<16x16xf32>
    %c1_i32_54 = arith.constant 1 : i32
    %96 = vector.broadcast %c1_i32_54 : i32 to vector<16x16xi32>
    %97 = arith.addi %89, %96 : vector<16x16xi32>
    %98 = arith.cmpi eq, %88, %97 : vector<16x16xi32>
    %cst_55 = arith.constant 1.000000e+00 : f32
    %cst_56 = arith.constant 0.000000e+00 : f32
    %99 = vector.broadcast %cst_55 : f32 to vector<16x16xf32>
    %100 = vector.broadcast %cst_56 : f32 to vector<16x16xf32>
    %101 = arith.select %98, %99, %100 : vector<16x16xi1>, vector<16x16xf32>
    %c0_57 = arith.constant 0 : index
    %c0_58 = arith.constant 0 : index
    %102 = vector.load %arg11[%c0_57, %c0_58] : memref<8x1xf32, #tpu.memory_space<vmem>>, vector<8x1xf32>
    %cst_59 = arith.constant dense<0.000000e+00> : vector<16x16xf32>
    %103 = tpu.matmul %87, %95, %cst_59 {dimension_numbers = #tpu.dot_dimension_numbers<[1], [0], [0], [1], [0, 0, 1, 1], [], []>} : vector<16x16xf32>, vector<16x16xf32>, vector<16x16xf32> -> vector<16x16xf32>
    %c0_60 = arith.constant 0 : index
    %c0_61 = arith.constant 0 : index
    %c0_62 = arith.constant 0 : index
    %104 = vector.load %arg10[%c0_60, %c0_61, %c0_62] : memref<3x8x16xf32, #tpu.memory_space<vmem>>, vector<1x8x16xf32>
    %105 = vector.shape_cast %104 : vector<1x8x16xf32> to vector<8x16xf32>
    %cst_63 = arith.constant dense<0.000000e+00> : vector<8x16xf32>
    %106 = tpu.matmul %105, %103, %cst_63 {dimension_numbers = #tpu.dot_dimension_numbers<[1], [0], [0], [1], [0, 0, 1, 1], [], []>} : vector<8x16xf32>, vector<16x16xf32>, vector<8x16xf32> -> vector<8x16xf32>
    %107 = vector.broadcast %102 : vector<8x1xf32> to vector<8x16xf32>
    %108 = arith.addf %107, %106 : vector<8x16xf32>
    %c1 = arith.constant 1 : index
    %c0_64 = arith.constant 0 : index
    %c0_65 = arith.constant 0 : index
    %109 = vector.load %arg10[%c1, %c0_64, %c0_65] : memref<3x8x16xf32, #tpu.memory_space<vmem>>, vector<1x8x16xf32>
    %110 = vector.shape_cast %109 : vector<1x8x16xf32> to vector<8x16xf32>
    %cst_66 = arith.constant dense<0.000000e+00> : vector<8x16xf32>
    %111 = tpu.matmul %110, %87, %cst_66 {dimension_numbers = #tpu.dot_dimension_numbers<[1], [0], [0], [1], [0, 0, 1, 1], [], []>} : vector<8x16xf32>, vector<16x16xf32>, vector<8x16xf32> -> vector<8x16xf32>
    %112 = arith.addf %108, %111 : vector<8x16xf32>
    %cst_67 = arith.constant dense<0.000000e+00> : vector<16x16xf32>
    %113 = tpu.matmul %87, %101, %cst_67 {dimension_numbers = #tpu.dot_dimension_numbers<[1], [0], [0], [1], [0, 0, 1, 1], [], []>} : vector<16x16xf32>, vector<16x16xf32>, vector<16x16xf32> -> vector<16x16xf32>
    %c2 = arith.constant 2 : index
    %c0_68 = arith.constant 0 : index
    %c0_69 = arith.constant 0 : index
    %114 = vector.load %arg10[%c2, %c0_68, %c0_69] : memref<3x8x16xf32, #tpu.memory_space<vmem>>, vector<1x8x16xf32>
    %115 = vector.shape_cast %114 : vector<1x8x16xf32> to vector<8x16xf32>
    %cst_70 = arith.constant dense<0.000000e+00> : vector<8x16xf32>
    %116 = tpu.matmul %115, %113, %cst_70 {dimension_numbers = #tpu.dot_dimension_numbers<[1], [0], [0], [1], [0, 0, 1, 1], [], []>} : vector<8x16xf32>, vector<16x16xf32>, vector<8x16xf32> -> vector<8x16xf32>
    %117 = arith.addf %112, %116 : vector<8x16xf32>
    %cst_71 = arith.constant 0.000000e+00 : f32
    %118 = vector.broadcast %cst_71 : f32 to vector<8x16xf32>
    %119 = arith.maximumf %117, %118 : vector<8x16xf32>
    %c0_72 = arith.constant 0 : index
    %c0_73 = arith.constant 0 : index
    %120 = vector.load %arg13[%c0_72, %c0_73] : memref<8x1xf32, #tpu.memory_space<vmem>>, vector<8x1xf32>
    %cst_74 = arith.constant dense<0.000000e+00> : vector<8x16xf32>
    %121 = tpu.matmul %119, %95, %cst_74 {dimension_numbers = #tpu.dot_dimension_numbers<[1], [0], [0], [1], [0, 0, 1, 1], [], []>} : vector<8x16xf32>, vector<16x16xf32>, vector<8x16xf32> -> vector<8x16xf32>
    %c0_75 = arith.constant 0 : index
    %c0_76 = arith.constant 0 : index
    %c0_77 = arith.constant 0 : index
    %122 = vector.load %arg12[%c0_75, %c0_76, %c0_77] : memref<3x8x8xf32, #tpu.memory_space<vmem>>, vector<1x8x8xf32>
    %123 = vector.shape_cast %122 : vector<1x8x8xf32> to vector<8x8xf32>
    %cst_78 = arith.constant dense<0.000000e+00> : vector<8x16xf32>
    %124 = tpu.matmul %123, %121, %cst_78 {dimension_numbers = #tpu.dot_dimension_numbers<[1], [0], [0], [1], [0, 0, 1, 1], [], []>} : vector<8x8xf32>, vector<8x16xf32>, vector<8x16xf32> -> vector<8x16xf32>
    %125 = vector.broadcast %120 : vector<8x1xf32> to vector<8x16xf32>
    %126 = arith.addf %125, %124 : vector<8x16xf32>
    %c1_79 = arith.constant 1 : index
    %c0_80 = arith.constant 0 : index
    %c0_81 = arith.constant 0 : index
    %127 = vector.load %arg12[%c1_79, %c0_80, %c0_81] : memref<3x8x8xf32, #tpu.memory_space<vmem>>, vector<1x8x8xf32>
    %128 = vector.shape_cast %127 : vector<1x8x8xf32> to vector<8x8xf32>
    %cst_82 = arith.constant dense<0.000000e+00> : vector<8x16xf32>
    %129 = tpu.matmul %128, %119, %cst_82 {dimension_numbers = #tpu.dot_dimension_numbers<[1], [0], [0], [1], [0, 0, 1, 1], [], []>} : vector<8x8xf32>, vector<8x16xf32>, vector<8x16xf32> -> vector<8x16xf32>
    %130 = arith.addf %126, %129 : vector<8x16xf32>
    %cst_83 = arith.constant dense<0.000000e+00> : vector<8x16xf32>
    %131 = tpu.matmul %119, %101, %cst_83 {dimension_numbers = #tpu.dot_dimension_numbers<[1], [0], [0], [1], [0, 0, 1, 1], [], []>} : vector<8x16xf32>, vector<16x16xf32>, vector<8x16xf32> -> vector<8x16xf32>
    %c2_84 = arith.constant 2 : index
    %c0_85 = arith.constant 0 : index
    %c0_86 = arith.constant 0 : index
    %132 = vector.load %arg12[%c2_84, %c0_85, %c0_86] : memref<3x8x8xf32, #tpu.memory_space<vmem>>, vector<1x8x8xf32>
    %133 = vector.shape_cast %132 : vector<1x8x8xf32> to vector<8x8xf32>
    %cst_87 = arith.constant dense<0.000000e+00> : vector<8x16xf32>
    %134 = tpu.matmul %133, %131, %cst_87 {dimension_numbers = #tpu.dot_dimension_numbers<[1], [0], [0], [1], [0, 0, 1, 1], [], []>} : vector<8x8xf32>, vector<8x16xf32>, vector<8x16xf32> -> vector<8x16xf32>
    %135 = arith.addf %130, %134 : vector<8x16xf32>
    %cst_88 = arith.constant 0.000000e+00 : f32
    %136 = vector.broadcast %cst_88 : f32 to vector<8x16xf32>
    %137 = arith.maximumf %135, %136 : vector<8x16xf32>
    %c0_89 = arith.constant 0 : index
    %c0_90 = arith.constant 0 : index
    %138 = vector.load %arg15[%c0_89, %c0_90] : memref<8x1xf32, #tpu.memory_space<vmem>>, vector<8x1xf32>
    %cst_91 = arith.constant dense<0.000000e+00> : vector<8x16xf32>
    %139 = tpu.matmul %137, %95, %cst_91 {dimension_numbers = #tpu.dot_dimension_numbers<[1], [0], [0], [1], [0, 0, 1, 1], [], []>} : vector<8x16xf32>, vector<16x16xf32>, vector<8x16xf32> -> vector<8x16xf32>
    %c0_92 = arith.constant 0 : index
    %c0_93 = arith.constant 0 : index
    %c0_94 = arith.constant 0 : index
    %140 = vector.load %arg14[%c0_92, %c0_93, %c0_94] : memref<3x8x8xf32, #tpu.memory_space<vmem>>, vector<1x8x8xf32>
    %141 = vector.shape_cast %140 : vector<1x8x8xf32> to vector<8x8xf32>
    %cst_95 = arith.constant dense<0.000000e+00> : vector<8x16xf32>
    %142 = tpu.matmul %141, %139, %cst_95 {dimension_numbers = #tpu.dot_dimension_numbers<[1], [0], [0], [1], [0, 0, 1, 1], [], []>} : vector<8x8xf32>, vector<8x16xf32>, vector<8x16xf32> -> vector<8x16xf32>
    %143 = vector.broadcast %138 : vector<8x1xf32> to vector<8x16xf32>
    %144 = arith.addf %143, %142 : vector<8x16xf32>
    %c1_96 = arith.constant 1 : index
    %c0_97 = arith.constant 0 : index
    %c0_98 = arith.constant 0 : index
    %145 = vector.load %arg14[%c1_96, %c0_97, %c0_98] : memref<3x8x8xf32, #tpu.memory_space<vmem>>, vector<1x8x8xf32>
    %146 = vector.shape_cast %145 : vector<1x8x8xf32> to vector<8x8xf32>
    %cst_99 = arith.constant dense<0.000000e+00> : vector<8x16xf32>
    %147 = tpu.matmul %146, %137, %cst_99 {dimension_numbers = #tpu.dot_dimension_numbers<[1], [0], [0], [1], [0, 0, 1, 1], [], []>} : vector<8x8xf32>, vector<8x16xf32>, vector<8x16xf32> -> vector<8x16xf32>
    %148 = arith.addf %144, %147 : vector<8x16xf32>
    %cst_100 = arith.constant dense<0.000000e+00> : vector<8x16xf32>
    %149 = tpu.matmul %137, %101, %cst_100 {dimension_numbers = #tpu.dot_dimension_numbers<[1], [0], [0], [1], [0, 0, 1, 1], [], []>} : vector<8x16xf32>, vector<16x16xf32>, vector<8x16xf32> -> vector<8x16xf32>
    %c2_101 = arith.constant 2 : index
    %c0_102 = arith.constant 0 : index
    %c0_103 = arith.constant 0 : index
    %150 = vector.load %arg14[%c2_101, %c0_102, %c0_103] : memref<3x8x8xf32, #tpu.memory_space<vmem>>, vector<1x8x8xf32>
    %151 = vector.shape_cast %150 : vector<1x8x8xf32> to vector<8x8xf32>
    %cst_104 = arith.constant dense<0.000000e+00> : vector<8x16xf32>
    %152 = tpu.matmul %151, %149, %cst_104 {dimension_numbers = #tpu.dot_dimension_numbers<[1], [0], [0], [1], [0, 0, 1, 1], [], []>} : vector<8x8xf32>, vector<8x16xf32>, vector<8x16xf32> -> vector<8x16xf32>
    %153 = arith.addf %148, %152 : vector<8x16xf32>
    %cst_105 = arith.constant 0.000000e+00 : f32
    %154 = vector.broadcast %cst_105 : f32 to vector<8x16xf32>
    %155 = arith.maximumf %153, %154 : vector<8x16xf32>
    %c0_106 = arith.constant 0 : index
    %c0_107 = arith.constant 0 : index
    %156 = vector.load %arg17[%c0_106, %c0_107] : memref<16x1xf32, #tpu.memory_space<vmem>>, vector<16x1xf32>
    %cst_108 = arith.constant dense<0.000000e+00> : vector<8x16xf32>
    %157 = tpu.matmul %155, %95, %cst_108 {dimension_numbers = #tpu.dot_dimension_numbers<[1], [0], [0], [1], [0, 0, 1, 1], [], []>} : vector<8x16xf32>, vector<16x16xf32>, vector<8x16xf32> -> vector<8x16xf32>
    %c0_109 = arith.constant 0 : index
    %c0_110 = arith.constant 0 : index
    %c0_111 = arith.constant 0 : index
    %158 = vector.load %arg16[%c0_109, %c0_110, %c0_111] : memref<3x16x8xf32, #tpu.memory_space<vmem>>, vector<1x16x8xf32>
    %159 = vector.shape_cast %158 : vector<1x16x8xf32> to vector<16x8xf32>
    %cst_112 = arith.constant dense<0.000000e+00> : vector<16x16xf32>
    %160 = tpu.matmul %159, %157, %cst_112 {dimension_numbers = #tpu.dot_dimension_numbers<[1], [0], [0], [1], [0, 0, 1, 1], [], []>} : vector<16x8xf32>, vector<8x16xf32>, vector<16x16xf32> -> vector<16x16xf32>
    %161 = vector.broadcast %156 : vector<16x1xf32> to vector<16x16xf32>
    %162 = arith.addf %161, %160 : vector<16x16xf32>
    %c1_113 = arith.constant 1 : index
    %c0_114 = arith.constant 0 : index
    %c0_115 = arith.constant 0 : index
    %163 = vector.load %arg16[%c1_113, %c0_114, %c0_115] : memref<3x16x8xf32, #tpu.memory_space<vmem>>, vector<1x16x8xf32>
    %164 = vector.shape_cast %163 : vector<1x16x8xf32> to vector<16x8xf32>
    %cst_116 = arith.constant dense<0.000000e+00> : vector<16x16xf32>
    %165 = tpu.matmul %164, %155, %cst_116 {dimension_numbers = #tpu.dot_dimension_numbers<[1], [0], [0], [1], [0, 0, 1, 1], [], []>} : vector<16x8xf32>, vector<8x16xf32>, vector<16x16xf32> -> vector<16x16xf32>
    %166 = arith.addf %162, %165 : vector<16x16xf32>
    %cst_117 = arith.constant dense<0.000000e+00> : vector<8x16xf32>
    %167 = tpu.matmul %155, %101, %cst_117 {dimension_numbers = #tpu.dot_dimension_numbers<[1], [0], [0], [1], [0, 0, 1, 1], [], []>} : vector<8x16xf32>, vector<16x16xf32>, vector<8x16xf32> -> vector<8x16xf32>
    %c2_118 = arith.constant 2 : index
    %c0_119 = arith.constant 0 : index
    %c0_120 = arith.constant 0 : index
    %168 = vector.load %arg16[%c2_118, %c0_119, %c0_120] : memref<3x16x8xf32, #tpu.memory_space<vmem>>, vector<1x16x8xf32>
    %169 = vector.shape_cast %168 : vector<1x16x8xf32> to vector<16x8xf32>
    %cst_121 = arith.constant dense<0.000000e+00> : vector<16x16xf32>
    %170 = tpu.matmul %169, %167, %cst_121 {dimension_numbers = #tpu.dot_dimension_numbers<[1], [0], [0], [1], [0, 0, 1, 1], [], []>} : vector<16x8xf32>, vector<8x16xf32>, vector<16x16xf32> -> vector<16x16xf32>
    %171 = arith.addf %166, %170 : vector<16x16xf32>
    %cst_122 = arith.constant 0.000000e+00 : f32
    %172 = vector.broadcast %cst_122 : f32 to vector<16x16xf32>
    %173 = arith.maximumf %171, %172 : vector<16x16xf32>
    %174 = arith.addf %173, %1 : vector<16x16xf32>
    %c0_123 = arith.constant 0 : index
    %c0_124 = arith.constant 0 : index
    %c0_125 = arith.constant 0 : index
    %175 = vector.load %arg19[%c0_123, %c0_124, %c0_125] : memref<1x16x16xf32, #tpu.memory_space<vmem>>, vector<1x16x16xf32>
    %176 = vector.shape_cast %175 : vector<1x16x16xf32> to vector<16x16xf32>
    %177 = vector.shape_cast %174 : vector<16x16xf32> to vector<1x16x16xf32>
    tpu.vector_store %arg19[%c0_123, %c0_124, %c0_125], %177 {strides = array<i32>} : memref<1x16x16xf32, #tpu.memory_space<vmem>>, vector<1x16x16xf32>,
    return
  }
  func.func @transform_0(%arg0: i32) -> (i32, i32, i32) {
    %c0_i32 = arith.constant 0 : i32
    %c0_i32_0 = arith.constant 0 : i32
    %c0_i32_1 = arith.constant 0 : i32
    return %arg0, %c0_i32, %c0_i32_0 : i32, i32, i32
  }
  func.func @transform_1(%arg0: i32) -> (i32, i32) {
    %c0_i32 = arith.constant 0 : i32
    %c0_i32_0 = arith.constant 0 : i32
    %c0_i32_1 = arith.constant 0 : i32
    return %c0_i32, %c0_i32_0 : i32, i32
  }
  func.func @transform_2(%arg0: i32) -> (i32, i32) {
    %c0_i32 = arith.constant 0 : i32
    %c0_i32_0 = arith.constant 0 : i32
    %c0_i32_1 = arith.constant 0 : i32
    return %c0_i32, %c0_i32_0 : i32, i32
  }
  func.func @transform_3(%arg0: i32) -> (i32, i32) {
    %c0_i32 = arith.constant 0 : i32
    %c0_i32_0 = arith.constant 0 : i32
    %c0_i32_1 = arith.constant 0 : i32
    return %c0_i32, %c0_i32_0 : i32, i32
  }
  func.func @transform_4(%arg0: i32) -> (i32, i32) {
    %c0_i32 = arith.constant 0 : i32
    %c0_i32_0 = arith.constant 0 : i32
    %c0_i32_1 = arith.constant 0 : i32
    return %c0_i32, %c0_i32_0 : i32, i32
  }
  func.func @transform_5(%arg0: i32) -> (i32, i32) {
    %c0_i32 = arith.constant 0 : i32
    %c0_i32_0 = arith.constant 0 : i32
    %c0_i32_1 = arith.constant 0 : i32
    return %c0_i32, %c0_i32_0 : i32, i32
  }
  func.func @transform_6(%arg0: i32) -> (i32, i32) {
    %c0_i32 = arith.constant 0 : i32
    %c0_i32_0 = arith.constant 0 : i32
    %c0_i32_1 = arith.constant 0 : i32
    return %c0_i32, %c0_i32_0 : i32, i32
  }
  func.func @transform_7(%arg0: i32) -> (i32, i32) {
    %c0_i32 = arith.constant 0 : i32
    %c0_i32_0 = arith.constant 0 : i32
    %c0_i32_1 = arith.constant 0 : i32
    return %c0_i32, %c0_i32_0 : i32, i32
  }
  func.func @transform_8(%arg0: i32) -> (i32, i32) {
    %c0_i32 = arith.constant 0 : i32
    %c0_i32_0 = arith.constant 0 : i32
    %c0_i32_1 = arith.constant 0 : i32
    return %c0_i32, %c0_i32_0 : i32, i32
  }
  func.func @transform_9(%arg0: i32) -> (i32, i32, i32) {
    %c0_i32 = arith.constant 0 : i32
    %c0_i32_0 = arith.constant 0 : i32
    %c0_i32_1 = arith.constant 0 : i32
    %c0_i32_2 = arith.constant 0 : i32
    return %c0_i32, %c0_i32_0, %c0_i32_1 : i32, i32, i32
  }
  func.func @transform_10(%arg0: i32) -> (i32, i32) {
    %c0_i32 = arith.constant 0 : i32
    %c0_i32_0 = arith.constant 0 : i32
    %c0_i32_1 = arith.constant 0 : i32
    return %c0_i32, %c0_i32_0 : i32, i32
  }
  func.func @transform_11(%arg0: i32) -> (i32, i32, i32) {
    %c0_i32 = arith.constant 0 : i32
    %c0_i32_0 = arith.constant 0 : i32
    %c0_i32_1 = arith.constant 0 : i32
    %c0_i32_2 = arith.constant 0 : i32
    return %c0_i32, %c0_i32_0, %c0_i32_1 : i32, i32, i32
  }
  func.func @transform_12(%arg0: i32) -> (i32, i32) {
    %c0_i32 = arith.constant 0 : i32
    %c0_i32_0 = arith.constant 0 : i32
    %c0_i32_1 = arith.constant 0 : i32
    return %c0_i32, %c0_i32_0 : i32, i32
  }
  func.func @transform_13(%arg0: i32) -> (i32, i32, i32) {
    %c0_i32 = arith.constant 0 : i32
    %c0_i32_0 = arith.constant 0 : i32
    %c0_i32_1 = arith.constant 0 : i32
    %c0_i32_2 = arith.constant 0 : i32
    return %c0_i32, %c0_i32_0, %c0_i32_1 : i32, i32, i32
  }
  func.func @transform_14(%arg0: i32) -> (i32, i32) {
    %c0_i32 = arith.constant 0 : i32
    %c0_i32_0 = arith.constant 0 : i32
    %c0_i32_1 = arith.constant 0 : i32
    return %c0_i32, %c0_i32_0 : i32, i32
  }
  func.func @transform_15(%arg0: i32) -> (i32, i32, i32) {
    %c0_i32 = arith.constant 0 : i32
    %c0_i32_0 = arith.constant 0 : i32
    %c0_i32_1 = arith.constant 0 : i32
    %c0_i32_2 = arith.constant 0 : i32
    return %c0_i32, %c0_i32_0, %c0_i32_1 : i32, i32, i32
  }
  func.func @transform_16(%arg0: i32) -> (i32, i32) {
    %c0_i32 = arith.constant 0 : i32
    %c0_i32_0 = arith.constant 0 : i32
    %c0_i32_1 = arith.constant 0 : i32
    return %c0_i32, %c0_i32_0 : i32, i32
  }
  func.func @transform_17(%arg0: i32) -> i32 {
    %c0_i32 = arith.constant 0 : i32
    %c0_i32_0 = arith.constant 0 : i32
    return %c0_i32 : i32
  }
  func.func @transform_18(%arg0: i32) -> (i32, i32, i32) {
    %c0_i32 = arith.constant 0 : i32
    %c0_i32_0 = arith.constant 0 : i32
    %c0_i32_1 = arith.constant 0 : i32
    return %arg0, %c0_i32, %c0_i32_0 : i32, i32, i32
  }
}

</mosaic_0001>

<bundles_post_ra>
// kernel: tpu_custom_call.1
= control target key start
LH: loop header
LB: loop body
LE: loop exit
PB: predicated region body
PF: predicated region fallthrough
CT: control target
= control target key end

     0   :  { %s5130_s0 = inlined_call_operand.vmem [shape: f32[2,16,16], index: 0, kind: input, shape index: {}]   ;;  %s5131_s1 = inlined_call_operand.vmem [shape: f32[1,16], index: 1, kind: input, shape index: {}]   ;;  %s5132_s2 = inlined_call_operand.vmem [shape: f32[1,16], index: 2, kind: input, shape index: {}]   ;;  %s5133_s3 = inlined_call_operand.vmem [shape: f32[1,16], index: 3, kind: input, shape index: {}]   ;;  %s5134_s4 = inlined_call_operand.vmem [shape: f32[1,16], index: 4, kind: input, shape index: {}]   ;;  %s5135_s5 = inlined_call_operand.vmem [shape: f32[4,16], index: 5, kind: input, shape index: {}]   ;;  %s5136_s6 = inlined_call_operand.vmem [shape: f32[4,16], index: 6, kind: input, shape index: {}]   ;;  %s5137_s7 = inlined_call_operand.vmem [shape: f32[16,4], index: 7, kind: input, shape index: {}]   ;;  %s5138_s8 = inlined_call_operand.vmem [shape: f32[16,4], index: 8, kind: input, shape index: {}]   ;;  %s5139_s9 = inlined_call_operand.vmem [shape: f32[3,8,16], index: 9, kind: input, shape index: {}]   ;;  %s5140_s10 = inlined_call_operand.vmem [shape: f32[8,1], index: 10, kind: input, shape index: {}]   ;;  %s5141_s11 = inlined_call_operand.vmem [shape: f32[3,8,8], index: 11, kind: input, shape index: {}]   ;;  %s5142_s12 = inlined_call_operand.vmem [shape: f32[8,1], index: 12, kind: input, shape index: {}]   ;;  %s5143_s13 = inlined_call_operand.vmem [shape: f32[3,8,8], index: 13, kind: input, shape index: {}]   ;;  %s5144_s14 = inlined_call_operand.vmem [shape: f32[8,1], index: 14, kind: input, shape index: {}]   ;;  %s5145_s15 = inlined_call_operand.vmem [shape: f32[3,16,8], index: 15, kind: input, shape index: {}]   ;;  %s5146_s16 = inlined_call_operand.vmem [shape: f32[16,1], index: 16, kind: input, shape index: {}]   ;;  %s5147_s17 = inlined_call_operand.<no memory space> [shape: f32[1], index: 17, kind: input, shape index: {}]   ;;  %s5148_s18 = inlined_call_operand.hbm [shape: f32[2,16,16], index: 18, kind: output, shape index: {}]  }
   0x1   :  { %5152 = sst [smem:[#allocation9_spill]] %s5130_s0 }
   0x2   :  { %5153 = sst [smem:[#allocation10_spill]] %s5131_s1 }
   0x3   :  { %5154 = sst [smem:[#allocation11_spill]] %s5132_s2 }
   0x4   :  { %23 = sst [smem:[#allocation2]] %s5147_s17 }
   0x5   :  { %24 = vsyncpa [#allocation4], 0 }
   0x6   :  { %26 = vsyncpa [#allocation4 + $0x1], 0  ;;  %s4677_s29 = smov 0   ;;  %s4679_s30 = smov 0  }
   0x7   :  { %s4681_s0 = smov 0   ;;  %s4683_s19 = smov 0  }
   0x8 LB: > { %5155 = sst [smem:[#allocation6_spill]] %s4565_s0  ;;  %s4698_s17 = sadd.s32 4294967295, %s4569_s19   ;;  %s4569_s19 = sphi %s4683_s19, %s5175_s19   ;;  %s4565_s0 = sphi %s4681_s0, %s5177_s0   ;;  %s4561_s30 = sphi %s4679_s30, %s5179_s30   ;;  %s4557_s29 = sphi %s4677_s29, %s5178_s29  }
   0x9   : > { %s3858_s1 = sadd.s32 4294967294, %s4569_s19   ;;  %s4702_s20 = sadd.s32 1, %s4569_s19  }
   0xa   : > { %5156 = sst [smem:[#allocation7_spill]] %s4702_s20  ;;  %s422_s21 = sadd.s32 1, %s4565_s0 }
   0xb   : > { %s419_s22 = ssub.s32 %s4569_s19, %s4702_s20  ;;  %p432_p0 = scmp.ne.s32.totalorder %s4565_s0, %s4561_s30 }
   0xc   : > { %p420_p1 = scmp.eq.s32.totalorder %s419_s22, 0  ;;  %p433_p2 = scmp.eq.s32.totalorder %s4698_s17, 1 }
   0xd   : > { %p438_p3 = scmp.ne.s32.totalorder %s4561_s30, %s4557_s29  ;;  %p439_p4 = scmp.eq.s32.totalorder %s3858_s1, 1 }
   0xe   : > { %s4713_s2 = scalar_select %p420_p1, %s4565_s0, %s422_s21  }
   0xf   : > { %p4715_p5 = por %p433_p2, %p432_p0  ;;  %p4719_p6 = por %p439_p4, %p438_p3 }
  0x10   : > { %5157 = sst [smem:[#allocation8_spill]] %s4713_s2  ;;  %p3861_p7 = scmp.ge.s32.totalorder %s4569_s19, 1 }
  0x11   : > { %p516_p8 = scmp.lt.s32.totalorder %s4569_s19, 3 }
  0x13   : > { %p517_p9 = pnand %p3861_p7, %p516_p8 }
  0x14   : > { %p570_p10 = scmp.lt.s32.totalorder (!%p517_p9), %s4698_s17, 1  ;;  %v4571_v0 = vmov (!%p517_p9), 0.0|0.0   ;;  %vm4572_vm0 = vmmov (!%p517_p9), 0   ;;  %v4573_v1 = vmov (!%p517_p9), 0.0   ;;  %s5160_s1 = sld [smem:[#allocation9_spill]] (!%p517_p9)  ;;  %vm578_vm1 = vcmask (!%p517_p9), 130048  }
  0x15   : > { %520 = sbr.rel (%p517_p9) target bundleno = 3272 (0xcc8), region = 92  ;;  %4341 = vmatprep.subr.bf16.mxu1 (!%p517_p9), %v4571_v0  ;;  %4091 = vmatprep.mubr.msk.f32.mxu1 (!%p517_p9), %vm4572_vm0, %v4573_v1  ;;  %s5161_s0 = sld [smem:[#allocation10_spill]] (!%p517_p9)  ;;  %v726_v6 = vld [vmem:[%s5133_s3] sm:$0x1] (!%p517_p9)  ;;  %v1024_v9 = vlaneseq (!%p517_p9)  ;;  %v4574_v18 = vmov (!%p517_p9), 1.0|1.0  }
  0x16   : > { %4347 = vmatprep.subr.bf16.mxu0 (!%p517_p9), %v4571_v0  ;;  %4105 = vmatprep.mubr.msk.f32.mxu0 (!%p517_p9), %vm4572_vm0, %v4573_v1  ;;  %v800_v8 = vld [vmem:[%s5134_s4] sm:$0x1] (!%p517_p9)  ;;  %vm1651_vm14 = vcmask (!%p517_p9), 7168   ;;  %vm1658_vm15 = vcmask (!%p517_p9), 1040384   ;;  %s567_s22 = sand.u32 (!%p517_p9), 1, %s4561_s30   ;;  %s3970_s2 = sshll.u32 (!%p517_p9), %s4698_s17, 8 }
  0x17   : > { %v4772_v10 = vand.u32 (!%p517_p9), 127, %v1024_v9  ;;  %v875_v11 = vld [vmem:[%s5135_s5] sm:$0xf] (!%p517_p9)  ;;  %v4782_v13 = vshrl.u32 (!%p517_p9), %v1024_v9, 7  ;;  %s5082_s28 = scalar_lea.hbm (!%p517_p9), %s5148_s18, %s3970_s2 }
  0x18   : > { %v949_v12 = vld [vmem:[%s5136_s6] sm:$0xf] (!%p517_p9) }
  0x19   : > { %v1029_v14 = vmul.u32 (!%p517_p9), 2, %v4772_v10  ;;  %v4790_v15 = vadd.s32 (!%p517_p9), 8, %v4782_v13 }
  0x1b   : > { %v577_v5 = vld [vmem:[%s5161_s0] sm:$0x1] (!%p517_p9)  ;;  %v1034_v16 = vadd.s32 (!%p517_p9), 1, %v1029_v14  ;;  %vm1030_vm2 = vcmp.eq.s32.totalorder (!%p517_p9), %v4782_v13, %v1029_v14  ;;  %vm1031_vm3 = vcmp.eq.s32.totalorder (!%p517_p9), %v4790_v15, %v1029_v14  ;;  %v1039_v24 = vadd.s32 (!%p517_p9), 8, %v1029_v14 }
  0x1c   : > { %s571_s25 = scalar_select %p570_p10, %s4698_s17, 1  ;;  %vm4796_vm6 = vmpackc.low %vm1031_vm3, %vm1030_vm2  ;;  %v1044_v25 = vadd.s32 9, %v1029_v14  ;;  %vm1853_vm2 = vcmask 31744  }
  0x1d   : > { %vm1035_vm4 = vcmp.eq.s32.totalorder %v4782_v13, %v1034_v16  ;;  %vm1036_vm5 = vcmp.eq.s32.totalorder %v4790_v15, %v1034_v16  ;;  %vm1040_vm8 = vcmp.eq.s32.totalorder %v4782_v13, %v1039_v24  ;;  %vm1041_vm9 = vcmp.eq.s32.totalorder %v4790_v15, %v1039_v24  ;;  %vm4385_vm3 = vmpackc.low %vm1853_vm2, %vm1853_vm2  ;;  %s5089_s17 = scalar_lea.sflag [#allocation4], %s567_s22 }
  0x1e   : > { %s3969_s26 = sshll.u32 %s571_s25, 4  ;;  %vm4803_vm7 = vmpackc.low %vm1036_vm5, %vm1035_vm4  ;;  %vm1045_vm10 = vcmp.eq.s32.totalorder %v4782_v13, %v1044_v25  ;;  %vm1046_vm11 = vcmp.eq.s32.totalorder %v4790_v15, %v1044_v25  ;;  %vm2038_vm4 = vcmask 1043456   ;;  %s3862_s25 = sshll.u32 %s567_s22, 4 }
  0x1f   : > { %s574_s21 = scalar_lea.vmem %s5160_s1, %s3969_s26  ;;  %s5162_s26 = sld [smem:[#allocation11_spill]]  ;;  %vm4816_vm12 = vmpackc.low %vm1041_vm9, %vm1040_vm8 }
  0x20   : > { %v4736_v2 = vld [vmem:[%s574_s21] sm:$0xff]  ;;  %v4738_v3 = vld [vmem:[%s574_s21 + $0x8] sm:$0xff]  ;;  %vm4820_vm13 = vmpackc.low %vm1046_vm11, %vm1045_vm10  ;;  %s2203_s21 = sld [smem:[#allocation2]]  ;;  %vm2684_vm11 = vcmask 64512   ;;  %s569_s0 = scalar_lea.vmem [#allocation3], %s3862_s25 }
  0x21   : > { %v4342_v4 = vpack.c.bf16 %v4738_v3, %v4736_v2 }
  0x23   : > { %4343 = vmatpush3.bf16.msra.mxu1 %v4342_v4  ;;  %4349 = vmatpush3.bf16.msra.mxu0 %v4342_v4 }
  0x24   : > { %4344 = vmatprep.subr.bf16.mxu1 %v4571_v0  ;;  %4353 = vmatprep.subr.bf16.mxu0 %v4571_v0 }
  0x25   : > { %v652_v7 = vld [vmem:[%s5162_s26] sm:$0x1]  ;;  %s3796_s26 = sshll.u32 %s569_s0, 4  ;;  %s5084_s26 = int_to_ptr.vmem [resolvable:$true] %s3796_s26 }
  0x26   : > { %4092 = vmatmul.mubr.msk.f32.vlgmr.msra.gmra.mrb[0].mxu1 %vm578_vm1, %v577_v5  ;;  %4106 = vmatmul.mubr.msk.f32.vlgmr.msra.gmra.mrb[0].mxu0 %vm578_vm1, %v726_v6  ;;  %s4507_s1 = scalar_lea.vmem %s5084_s26, 256 }
  0x27   : > { %4346 = vmatpush3.bf16.msra.mxu1 %v4342_v4  ;;  %4098 = vmatprep.mubr.msk.f32.mxu1 %vm4572_vm0, %v4573_v1  ;;  %p4508_p11 = scmp.ne.s32.totalorder %s5084_s26, %s4507_s1 }
  0x28   : > { %4350 = vmatprep.subr.bf16.mxu1 %v4571_v0  ;;  %4355 = vmatpush3.bf16.msra.mxu0 %v4342_v4 }
  0x29   : > { %4119 = vmatprep.mubr.msk.f32.mxu0 %vm4572_vm0, %v4573_v1  ;;  %4359 = vmatprep.subr.bf16.mxu0 %v4571_v0  ;;  %p4509_p12 = pnand %p4508_p11, %p4715_p5 }
  0x2a   : > { %4099 = vmatmul.mubr.msk.f32.vlgmr.msra.gmra.mrb[2].mxu1 %vm578_vm1, %v652_v7 }
  0x2b   : > { %4352 = vmatpush3.bf16.msra.mxu1 %v4342_v4  ;;  %4112 = vmatprep.mubr.msk.f32.mxu1 %vm4572_vm0, %v4573_v1  ;;  %p4510_p13 = pneg %p4509_p12 }
  0x2c   : > { %4356 = vmatprep.subr.bf16.mxu1 %v4571_v0  ;;  %4120 = vmatmul.mubr.msk.f32.vlgmr.msra.gmra.mrb[2].mxu0 %vm578_vm1, %v875_v11 }
  0x2d   : > { %4133 = vmatprep.mubr.msk.f32.mxu0 %vm4572_vm0, %v4573_v1  ;;  %4361 = vmatpush3.bf16.msk.msra.mxu0 %vm4796_vm6, %v4574_v18 }
  0x2e   : > { %4113 = vmatmul.mubr.msk.f32.vlgmr.msra.gmra.mrb[4].mxu1 %vm578_vm1, %v800_v8  ;;  %4365 = vmatprep.subr.bf16.mxu0 %v4571_v0 }
  0x2f   : > { %4358 = vmatpush3.bf16.msra.mxu1 %v4342_v4  ;;  %4126 = vmatprep.mubr.msk.f32.mxu1 %vm4572_vm0, %v4573_v1 }
  0x30   : > { %4362 = vmatprep.subr.bf16.mxu1 %v4571_v0 }
  0x32   : > { %4127 = vmatmul.mubr.msk.f32.vlgmr.msra.gmra.mrb[6].mxu1 %vm578_vm1, %v949_v12 }
  0x33   : > { %4140 = vmatprep.mubr.msk.f32.mxu1 %vm4572_vm0, %v4573_v1  ;;  %4364 = vmatpush3.bf16.msk.msra.mxu1 %vm4803_vm7, %v4574_v18 }
  0x34   : > { %4368 = vmatprep.subr.bf16.mxu1 %v4571_v0 }
  0xf9   : > { %v648_v20 = vpop.f32.mrb[0].mxu1  ;;  %v796_v21 = vpop.f32.mrb[0].mxu0 }
  0xfa   : > { %v4093_v22 = vpop.f32.mrb[1].mxu1  ;;  %v4107_v23 = vpop.f32.mrb[1].mxu0 }
  0xfd   : > { %v722_v26 = vpop.f32.mrb[2].mxu1 }
  0xfe   : > { %1619 = vxpose.xlu0.b32.start.end [1/1] (short) (narrow) %v722_v26, 16  ;;  %v4100_v27 = vpop.f32.mrb[3].mxu1 }
  0xff   : > { %v945_v33 = vpop.f32.mrb[2].mxu0  ;;  %v2030_v27 = vld [vmem:[%s5138_s8] sm:$0xff] }
 0x100   : > { %v4121_v36 = vpop.f32.mrb[3].mxu0 }
 0x101   : > { %v870_v28 = vpop.f32.mrb[4].mxu1 }
 0x102   : > { %v874_v30 = vmax.f32 %v796_v21, %v870_v28  ;;  %v4114_v31 = vpop.f32.mrb[5].mxu1 }
 0x103   : > { %1737 = vxpose.xlu0.b32.start.end [1/1] (short) (narrow) %v648_v20, 16 }
 0x104   : > { %4134 = vmatmul.mubr.msk.f32.vlgmr.msra.gmra.mrb[4].mxu0 %vm578_vm1, %v874_v30  ;;  %4141 = vmatmul.mubr.msk.f32.vlgmr.msra.gmra.mrb[8].mxu1 %vm578_vm1, %v874_v30 }
 0x105   : > { %4367 = vmatpush3.bf16.msk.msra.mxu0 %vm4816_vm12, %v4574_v18  ;;  %4370 = vmatpush3.bf16.msk.msra.mxu1 %vm4820_vm13, %v4574_v18  ;;  %v1019_v34 = vpop.f32.mrb[6].mxu1 }
 0x106   : > { %4147 = vmatprep.mubr.msk.f32.mxu0 %vm4572_vm0, %v4573_v1  ;;  %4154 = vmatprep.mubr.msk.f32.mxu1 %vm4572_vm0, %v4573_v1  ;;  %v1023_v35 = vmax.f32 %v945_v33, %v1019_v34  ;;  %v4128_v37 = vpop.f32.mrb[7].mxu1  ;;  %v2028_v33 = vld [vmem:[%s5137_s7] sm:$0xff]  ;;  %v2029_v34 = vld [vmem:[%s5137_s7 + $0x8] sm:$0xff] }
 0x107   : > { %4371 = vmatprep.subr.bf16.mxu0 %v4571_v0  ;;  %4374 = vmatprep.subr.bf16.mxu1 %v4571_v0  ;;  %v2214_v37 = vadd.s32 1, %v4772_v10 }
 0x108   : > { %4148 = vmatmul.mubr.msk.f32.vlgmr.msra.gmra.mrb[6].mxu0 %vm578_vm1, %v874_v30  ;;  %4155 = vmatmul.mubr.msk.f32.vlgmr.msra.gmra.mrb[10].mxu1 %vm578_vm1, %v874_v30  ;;  %v2031_v30 = vld [vmem:[%s5138_s8 + $0x8] sm:$0xff] }
 0x109   : > { %4373 = vmatpush3.bf16.msk.msra.mxu0 %vm4796_vm6, %v4574_v18  ;;  %4376 = vmatpush3.bf16.msk.msra.mxu1 %vm4803_vm7, %v4574_v18  ;;  %vm2215_vm8 = vcmp.eq.s32.totalorder %v4782_v13, %v2214_v37  ;;  %vm2216_vm9 = vcmp.eq.s32.totalorder %v4790_v15, %v2214_v37  ;;  %v3953_v37 = vld [vmem:[%s5145_s15 + $0x10] sm:$0xff] }
 0x10a   : > { %4161 = vmatprep.mubr.msk.f32.mxu0 %vm4572_vm0, %v4573_v1  ;;  %4168 = vmatprep.mubr.msk.f32.mxu1 %vm4572_vm0, %v4573_v1  ;;  %vm4919_vm10 = vmpackc.low %vm2216_vm9, %vm2215_vm8 }
 0x10b   : > { %4377 = vmatprep.subr.bf16.mxu0 %v4571_v0  ;;  %4380 = vmatprep.subr.bf16.mxu1 %v4571_v0 }
 0x10c   : > { %4162 = vmatmul.mubr.msk.f32.vlgmr.msra.gmra.mrb[8].mxu0 %vm578_vm1, %v1023_v35  ;;  %4169 = vmatmul.mubr.msk.f32.vlgmr.msra.gmra.mrb[12].mxu1 %vm578_vm1, %v1023_v35 }
 0x10d   : > { %4379 = vmatpush3.bf16.msk.msra.mxu0 %vm4816_vm12, %v4574_v18  ;;  %4382 = vmatpush3.bf16.msk.msra.mxu1 %vm4820_vm13, %v4574_v18 }
 0x10e   : > { %4175 = vmatprep.mubr.msk.f32.mxu0 %vm4572_vm0, %v4573_v1  ;;  %4182 = vmatprep.mubr.msk.f32.mxu1 %vm4572_vm0, %v4573_v1 }
 0x10f   : > { %4383 = vmatprep.subr.bf16.mxu1 %v4571_v0 }
 0x110   : > { %4176 = vmatmul.mubr.msk.f32.vlgmr.msra.gmra.mrb[10].mxu0 %vm578_vm1, %v1023_v35  ;;  %4183 = vmatmul.mubr.msk.f32.vlgmr.msra.gmra.mrb[14].mxu1 %vm578_vm1, %v1023_v35  ;;  %v2209_v35 = vadd.s32 4294967295, %v4772_v10  ;;  %v2202_v10 = vmul.f32 2.0, %v4738_v3 }
 0x111   : > { %4199 = vmatprep.mubr.msk.f32.mxu1 %vm4572_vm0, %v4573_v1 }
 0x112   : > { %vm2210_vm5 = vcmp.eq.s32.totalorder %v4782_v13, %v2209_v35  ;;  %vm2211_vm6 = vcmp.eq.s32.totalorder %v4790_v15, %v2209_v35 }
 0x113   : > { %vm4906_vm7 = vmpackc.low %vm2211_vm6, %vm2210_vm5 }
 0x17e   : > { %v1635_v38 = vpop.trf.xlu0 }
 0x17f   : > { %4187 = vmatprep.mubr.msk.f32.mxu0 %vm1651_vm14, %v1635_v38  ;;  %v3954_v38 = vld [vmem:[%s5145_s15 + $0x18] sm:$0xff] }
 0x182   : > { %v1636_v39 = vpop.trf.xlu0 }
 0x186   : > { %v1753_v50 = vpop.trf.xlu0 }
 0x18a   : > { %v1754_v51 = vpop.trf.xlu0 }
 0x1d7   : > { %v1118_v40 = vpop.f32.mrb[4].mxu0  ;;  %v1188_v41 = vpop.f32.mrb[8].mxu1 }
 0x1d8   : > { %v1192_v42 = vmax.f32 %v1118_v40, %v1188_v41  ;;  %v4135_v43 = vpop.f32.mrb[5].mxu0  ;;  %v4142_v44 = vpop.f32.mrb[9].mxu1  ;;  %v2201_v41 = vmul.f32 2.0, %v4736_v2 }
 0x1db   : > { %v1259_v45 = vpop.f32.mrb[6].mxu0  ;;  %v1329_v46 = vpop.f32.mrb[10].mxu1 }
 0x1dc   : > { %v1333_v47 = vmax.f32 %v1259_v45, %v1329_v46  ;;  %v4149_v48 = vpop.f32.mrb[7].mxu0  ;;  %v4156_v49 = vpop.f32.mrb[11].mxu1  ;;  %v2219_v46 = vld [vmem:[%s5140_s10] sm:$0xff] }
 0x1dd   : > { %v2609_v48 = vld [vmem:[%s5142_s12] sm:$0xff] }
 0x1de   : > { %4185 = vmatprep.subr.msk.mxu0 %vm1658_vm15, %v1333_v47  ;;  %v2987_v49 = vld [vmem:[%s5144_s14] sm:$0xff] }
 0x1df   : > { %4186 = vmatpush3.msk.msra.mxu0 %vm1658_vm15, %v1333_v47  ;;  %v1403_v52 = vpop.f32.mrb[8].mxu0  ;;  %v1473_v53 = vpop.f32.mrb[12].mxu1  ;;  %v4575_v47 = vmov 0  }
 0x1e0   : > { %4188 = vmatmul.mubr.msk.f32.vlgmr.msra.gmra.mrb[12].mxu0 %vm1651_vm14, %v1636_v39  ;;  %4190 = vmatprep.subr.msk.mxu0 %vm1658_vm15, %v1192_v42  ;;  %v1477_v54 = vmax.f32 %v1403_v52, %v1473_v53  ;;  %v4163_v55 = vpop.f32.mrb[9].mxu0  ;;  %v4170_v56 = vpop.f32.mrb[13].mxu1  ;;  %v2204_v39 = vstv %s2203_s21  ;;  %s4576_s21 = smov [#allocation3]  }
 0x1e1   : > { %4191 = vmatpush3.msk.msra.mxu0 %vm1658_vm15, %v1192_v42  ;;  %4192 = vmatprep.mubr.msk.f32.mxu0 %vm1651_vm14, %v1753_v50  ;;  %v3364_v50 = vld [vmem:[%s5146_s16] sm:$0xff]  ;;  %s4511_s25 = sshll.u32 %s4576_s21, 4  ;;  %s4512_s25 = int_to_ptr.vmem [resolvable:$false] %s4511_s25 }
 0x1e2   : > { %4387 = vmatprep.subr.bf16.mxu0 %v4571_v0  ;;  %4497 = vset.pattern.permute.xlu1 %v4575_v47  ;;  %v2301_v56 = vld [vmem:[%s5139_s9] sm:$0xff]  ;;  %s4513_s2 = scalar_lea.vmem %s4512_s25, 512  ;;  %p4514_p0 = scmp.lt.s32.totalorder %s5084_s26, %s4512_s25 }
 0x1e3   : > { %v1544_v57 = vpop.f32.mrb[10].mxu0  ;;  %v1614_v58 = vpop.f32.mrb[14].mxu1  ;;  %4498 = vset.pattern.permute.xlu0 %v4575_v47  ;;  %p4515_p1 = scmp.lt.s32.totalorder %s4513_s2, %s4507_s1 }
 0x1e4   : > { %v1618_v59 = vmax.f32 %v1544_v57, %v1614_v58  ;;  %v4177_v60 = vpop.f32.mrb[11].mxu0  ;;  %v4184_v61 = vpop.f32.mrb[15].mxu1 }
 0x1e5   : > { %v3924_v60 = vld [vmem:[%s5139_s9 + $0x10] sm:$0xff]  ;;  %p4516_p2 = por %p4515_p1, %p4514_p0 }
 0x1e7   : > { %p4517_p3 = pnand %p4516_p2, %p4510_p13 }
 0x1e8   : > { %4193 = vmatmul.mubr.msk.f32.vlgmr.msra.gmra.mrb[12].mxu0 %vm1651_vm14, %v1754_v51  ;;  %v3365_v51 = vld [vmem:[%s5146_s16 + $0x8] sm:$0xff] }
 0x1e9   : > { %4206 = vmatprep.mubr.msk.f32.mxu0 %vm4572_vm0, %v4573_v1 }
 0x2bb   : > { %v4194_v62 = vpop.f32.mrb[12].mxu0 }
 0x2bc   : > { %v1844_v63 = vpop.f32.mrb[13].mxu0  ;;  %v1857_v5 = vsel %vm1853_vm2, %v4194_v62, -inf }
 0x2bd   : > { %v1854_v4 = vsel %vm1853_vm2, %v1844_v63, -inf }
 0x2be   : > { %1855 = vmax.xlane.f32.xlu1 %v1854_v4 }
 0x2c2   : > { %1858 = vmax.xlane.f32.xlu1 %v1857_v5 }
 0x34b   : > { %v1856_v6 = vpop.xlane.xlu1 %1855 }
 0x34c   : > { %v1860_v7 = vsub.f32 %v1844_v63, %v1856_v6  ;;  %v2683_v6 = vld [vmem:[%s5141_s11] sm:$0xff] }
 0x34e   : > { %v1862_v8 = vmul.f32 1.442695, %v1860_v7 }
 0x34f   : > { %v1859_v9 = vpop.xlane.xlu1 %1858 }
 0x350   : > { %4499 = vpow2.f32 %v1862_v8  ;;  %v1861_v11 = vsub.f32 %v4194_v62, %v1859_v9 }
 0x352   : > { %v1864_v12 = vmul.f32 1.442695, %v1861_v11 }
 0x354   : > { %4501 = vpow2.f32 %v1864_v12  ;;  %v3930_v12 = vld [vmem:[%s5141_s11 + $0x8] sm:$0xff] }
 0x35a   : > { %v4500_v14 = vpop.eup %4499 }
 0x35b   : > { %v1866_v16 = vsel %vm1853_vm2, %v4500_v14, 0.0 }
 0x35c   : > { %1867 = vadd.xlane.f32.xlu1 %v1866_v16 }
 0x35e   : > { %v4502_v17 = vpop.eup %4501 }
 0x35f   : > { %v1869_v19 = vsel %vm1853_vm2, %v4502_v17, 0.0 }
 0x360   : > { %1870 = vadd.xlane.f32.xlu0 %v1869_v19 }
 0x36d   : > { %2377 = vperm.xlu1 %4497, %v2219_v46  }
 0x371   : > { %2760 = vperm.xlu1 %4497, %v2609_v48  }
 0x375   : > { %3137 = vperm.xlu1 %4497, %v2987_v49  }
 0x379   : > { %3524 = vperm.xlu1 %4497, %v3364_v50  }
 0x37d   : > { %3529 = vperm.xlu1 %4497, %v3365_v51  }
 0x3e9   : > { %v1868_v20 = vpop.xlane.xlu1 %1867 }
 0x3ea   : > { %4503 = vrcp.f32 %v1868_v20 }
 0x3ed   : > { %v1871_v21 = vpop.xlane.xlu0 %1870  ;;  %v2378_v61 = vpop.permute.xlu1 %2377 }
 0x3ee   : > { %4505 = vrcp.f32 %v1871_v21 }
 0x3f1   : > { %v2761_v16 = vpop.permute.xlu1 %2760 }
 0x3f4   : > { %v4504_v22 = vpop.eup %4503 }
 0x3f5   : > { %v1874_v24 = vmul.f32 %v4504_v22, %v4500_v14  ;;  %v3935_v14 = vld [vmem:[%s5141_s11 + $0x10] sm:$0xff]  ;;  %v3061_v22 = vld [vmem:[%s5143_s13] sm:$0xff] }
 0x3f8   : > { %v4506_v23 = vpop.eup %4505 }
 0x3f9   : > { %v1875_v25 = vmul.f32 %v4506_v23, %v4502_v17 }
 0x3fb   : > { %v4384_v26 = vpack.c.bf16 %v1875_v25, %v1874_v24 }
 0x3fd   : > { %4386 = vmatpush3.bf16.xpose.msk.msra.mxu1 %vm4385_vm3, %v4384_v26  ;;  %4390 = vmatpush3.bf16.xpose.msk.msra.mxu0 %vm4385_vm3, %v4384_v26 }
 0x3fe   : > { %4392 = vmatprep.subr.msk.bf16.mxu0 %vm4906_vm7, %v4574_v18 }
 0x404   : > { %4200 = vmatmul.mubr.msk.f32.vlgmr.msra.gmra.mrb[16].mxu1 %vm1853_vm2, %v1477_v54  ;;  %4207 = vmatmul.mubr.msk.f32.vlgmr.msra.gmra.mrb[14].mxu0 %vm1853_vm2, %v1618_v59  ;;  %v3918_v59 = vld [vmem:[%s5139_s9 + $0x8] sm:$0xff] }
 0x405   : > { %4211 = vmatprep.mubr.msk.f32.mxu1 %vm1853_vm2, %v2030_v27  ;;  %4394 = vmatpush3.bf16.msk.msra.mxu0 %vm4906_vm7, %v4574_v18  ;;  %v3941_v27 = vld [vmem:[%s5143_s13 + $0x8] sm:$0xff] }
 0x406   : > { %4402 = vmatprep.subr.msk.bf16.mxu0 %vm4919_vm10, %v4574_v18 }
 0x4d7   : > { %v1951_v28 = vpop.f32.mrb[16].mxu1  ;;  %v2024_v29 = vpop.f32.mrb[14].mxu0 }
 0x4d8   : > { %v4201_v31 = vpop.f32.mrb[17].mxu1  ;;  %v4208_v32 = vpop.f32.mrb[15].mxu0  ;;  %4209 = vmatprep.subr.msk.mxu1 %vm2038_vm4, %v2024_v29 }
 0x4d9   : > { %4210 = vmatpush3.msk.msra.mxu1 %vm2038_vm4, %v2024_v29  ;;  %v3138_v29 = vpop.permute.xlu1 %3137 }
 0x4da   : > { %4212 = vmatmul.mubr.msk.f32.vlgmr.msra.gmra.mrb[18].mxu1 %vm1853_vm2, %v2031_v30  ;;  %4214 = vmatprep.subr.msk.mxu1 %vm2038_vm4, %v1951_v28 }
 0x4db   : > { %4215 = vmatpush3.msk.msra.mxu1 %vm2038_vm4, %v1951_v28  ;;  %4216 = vmatprep.mubr.msk.f32.mxu1 %vm1853_vm2, %v2028_v33  ;;  %v3946_v28 = vld [vmem:[%s5143_s13 + $0x10] sm:$0xff] }
 0x4dc   : > { %4395 = vmatprep.subr.bf16.mxu1 %v4571_v0 }
 0x4e2   : > { %4217 = vmatmul.mubr.msk.f32.vlgmr.msra.gmra.mrb[18].mxu1 %vm1853_vm2, %v2029_v34 }
 0x4e3   : > { %4230 = vmatprep.mubr.msk.f32.mxu1 %vm4572_vm0, %v4573_v1 }
 0x5b5   : > { %v4218_v40 = vpop.f32.mrb[18].mxu1 }
 0x5b6   : > { %v2206_v42 = vmul.f32 %v4218_v40, %v2204_v39  ;;  %v2192_v43 = vpop.f32.mrb[19].mxu1  ;;  %v3525_v40 = vpop.permute.xlu1 %3524 }
 0x5b7   : > { %v2205_v13 = vmul.f32 %v2204_v39, %v2192_v43  ;;  %v3960_v39 = vld [vmem:[%s5145_s15 + $0x20] sm:$0xff] }
 0x5b8   : > { %v2208_v44 = vadd.f32 %v2206_v42, %v2202_v10  ;;  %v3961_v10 = vld [vmem:[%s5145_s15 + $0x28] sm:$0xff] }
 0x5b9   : > { %v2207_v15 = vadd.f32 %v2205_v13, %v2201_v41 }
 0x5ba   : > { %v3530_v41 = vpop.permute.xlu1 %3529 }
 0x5bb   : > { %v4399_v45 = vpack.c.bf16 %v2208_v44, %v2207_v15  ;;  %4223 = vmatprep.mubr.msk.f32.mxu0 %vm578_vm1, %v2207_v15 }
 0x5bc   : > { %4224 = vmatmul.mubr.msk.f32.vlgmr.msra.gmra.mrb[16].mxu0 %vm578_vm1, %v2208_v44 }
 0x5bd   : > { %4404 = vmatpush3.bf16.msk.msra.mxu0 %vm4919_vm10, %v4574_v18  ;;  %4244 = vmatprep.mubr.msk.f32.mxu0 %vm578_vm1, %v2207_v15 }
 0x5be   : > { %4408 = vmatprep.subr.bf16.mxu0 %v4571_v0 }
 0x5c0   : > { %4245 = vmatmul.mubr.msk.f32.vlgmr.msra.gmra.mrb[18].mxu0 %vm578_vm1, %v2208_v44 }
 0x5c1   : > { %4410 = vmatpush3.bf16.msk.msra.mxu0 %vm4906_vm7, %v4574_v18  ;;  %4258 = vmatprep.mubr.msk.f32.mxu0 %vm4572_vm0, %v4573_v1 }
 0x5c2   : > { %4261 = vmatprep.subr.mxu0 %v4573_v1 }
 0x68f   : > { %v4225_v52 = vpop.f32.mrb[16].mxu0 }
 0x690   : > { %v2292_v53 = vpop.f32.mrb[17].mxu0 }
 0x691   : > { %v4396_v54 = vpack.c.bf16 %v4225_v52, %v2292_v53 }
 0x693   : > { %4397 = vmatpush3.bf16.msra.mxu1 %v4396_v54  ;;  %v4246_v55 = vpop.f32.mrb[18].mxu0 }
 0x694   : > { %v2523_v57 = vpop.f32.mrb[19].mxu0  ;;  %4398 = vmatprep.subr.bf16.mxu1 %v4571_v0 }
 0x695   : > { %v4406_v58 = vpack.c.bf16 %v4246_v55, %v2523_v57 }
 0x696   : > { %4231 = vmatmul.mubr.msk.f32.vlgmr.msra.gmra.mrb[20].mxu1 %vm578_vm1, %v2301_v56 }
 0x697   : > { %4400 = vmatpush3.bf16.msra.mxu1 %v4399_v45  ;;  %4237 = vmatprep.mubr.msk.f32.mxu1 %vm4572_vm0, %v4573_v1 }
 0x698   : > { %4405 = vmatprep.subr.bf16.mxu1 %v4571_v0 }
 0x69e   : > { %4238 = vmatmul.mubr.msk.f32.vlgmr.msra.gmra.mrb[20].mxu1 %vm578_vm1, %v3918_v59 }
 0x69f   : > { %4407 = vmatpush3.bf16.msra.mxu1 %v4406_v58  ;;  %4251 = vmatprep.mubr.msk.f32.mxu1 %vm4572_vm0, %v4573_v1 }
 0x6a0   : > { %4411 = vmatprep.subr.bf16.mxu1 %v4571_v0 }
 0x6a6   : > { %4252 = vmatmul.mubr.msk.f32.vlgmr.msra.gmra.mrb[20].mxu1 %vm578_vm1, %v3924_v60 }
 0x6a7   : > { %4413 = vmatpush3.bf16.msk.msra.mxu1 %vm4919_vm10, %v4574_v18  ;;  %4275 = vmatprep.mubr.msk.f32.mxu1 %vm4572_vm0, %v4573_v1 }
 0x6a8   : > { %4414 = vmatprep.subr.bf16.mxu1 %v4571_v0 }
 0x779   : > { %v2603_v62 = vpop.f32.mrb[20].mxu1 }
 0x77a   : > { %v4426_v63 = vadd.f32 %v2603_v62, %v2378_v61  ;;  %v4253_v4 = vpop.f32.mrb[21].mxu1 }
 0x77c   : > { %v2608_v5 = vmax.f32 %v4426_v63, 0.0 }
 0x77e   : > { %4259 = vmatmul.mubr.msk.f32.vlgmr.msra.gmra.mrb[20].mxu0 %vm578_vm1, %v2608_v5  ;;  %4276 = vmatmul.mubr.msk.f32.vlgmr.msra.gmra.mrb[22].mxu1 %vm578_vm1, %v2608_v5 }
 0x77f   : > { %4263 = vmatprep.mubr.msk.f32.mxu0 %vm4572_vm0, %v4573_v1  ;;  %4416 = vmatpush3.bf16.msk.msra.mxu1 %vm4906_vm7, %v4574_v18 }
 0x780   : > { %4287 = vmatprep.mubr.msk.f32.mxu1 %vm4572_vm0, %v4573_v1  ;;  %4290 = vmatprep.subr.mxu1 %v4573_v1 }
 0x851   : > { %v2679_v7 = vpop.f32.mrb[20].mxu0  ;;  %v2906_v8 = vpop.f32.mrb[22].mxu1 }
 0x852   : > { %v4260_v9 = vpop.f32.mrb[21].mxu0  ;;  %4262 = vmatpush3.msra.mxu0 %v2679_v7  ;;  %v4277_v11 = vpop.f32.mrb[23].mxu1 }
 0x853   : > { %4264 = vmatmul.mubr.msk.f32.vlgmr.msra.gmra.mrb[22].mxu0 %vm2684_vm11, %v2683_v6  ;;  %4266 = vmatprep.subr.mxu0 %v4573_v1 }
 0x854   : > { %4267 = vmatpush3.msra.mxu0 %v2608_v5  ;;  %4268 = vmatprep.mubr.msk.f32.mxu0 %vm4572_vm0, %v4573_v1 }
 0x855   : > { %4278 = vmatprep.subr.mxu0 %v4573_v1 }
 0x85b   : > { %4269 = vmatmul.mubr.msk.f32.vlgmr.msra.gmra.mrb[22].mxu0 %vm2684_vm11, %v3930_v12 }
 0x85c   : > { %4279 = vmatpush3.msra.mxu0 %v2906_v8  ;;  %4280 = vmatprep.mubr.msk.f32.mxu0 %vm4572_vm0, %v4573_v1 }
 0x85d   : > { %4417 = vmatprep.subr.bf16.mxu0 %v4571_v0 }
 0x863   : > { %4281 = vmatmul.mubr.msk.f32.vlgmr.msra.gmra.mrb[22].mxu0 %vm2684_vm11, %v3935_v14 }
 0x864   : > { %4419 = vmatpush3.bf16.msk.msra.mxu0 %vm4919_vm10, %v4574_v18  ;;  %4304 = vmatprep.mubr.msk.f32.mxu0 %vm4572_vm0, %v4573_v1 }
 0x865   : > { %4420 = vmatprep.subr.bf16.mxu0 %v4571_v0 }
 0x936   : > { %v2981_v17 = vpop.f32.mrb[22].mxu0 }
 0x937   : > { %v4427_v19 = vadd.f32 %v2981_v17, %v2761_v16  ;;  %v4282_v20 = vpop.f32.mrb[23].mxu0 }
 0x939   : > { %v2986_v21 = vmax.f32 %v4427_v19, 0.0 }
 0x93b   : > { %4288 = vmatmul.mubr.msk.f32.vlgmr.msra.gmra.mrb[24].mxu1 %vm578_vm1, %v2986_v21  ;;  %4305 = vmatmul.mubr.msk.f32.vlgmr.msra.gmra.mrb[24].mxu0 %vm578_vm1, %v2986_v21 }
 0x93c   : > { %4292 = vmatprep.mubr.msk.f32.mxu1 %vm4572_vm0, %v4573_v1  ;;  %4422 = vmatpush3.bf16.msk.msra.mxu0 %vm4906_vm7, %v4574_v18 }
 0x93d   : > { %4316 = vmatprep.mubr.msk.f32.mxu0 %vm4572_vm0, %v4573_v1 }
 0xa0e   : > { %v3057_v23 = vpop.f32.mrb[24].mxu1  ;;  %v3283_v24 = vpop.f32.mrb[24].mxu0 }
 0xa0f   : > { %v4289_v25 = vpop.f32.mrb[25].mxu1  ;;  %4291 = vmatpush3.msra.mxu1 %v3057_v23  ;;  %v4306_v26 = vpop.f32.mrb[25].mxu0 }
 0xa10   : > { %4293 = vmatmul.mubr.msk.f32.vlgmr.msra.gmra.mrb[26].mxu1 %vm2684_vm11, %v3061_v22  ;;  %4295 = vmatprep.subr.mxu1 %v4573_v1 }
 0xa11   : > { %4296 = vmatpush3.msra.mxu1 %v2986_v21  ;;  %4297 = vmatprep.mubr.msk.f32.mxu1 %vm4572_vm0, %v4573_v1 }
 0xa12   : > { %4307 = vmatprep.subr.mxu1 %v4573_v1 }
 0xa18   : > { %4298 = vmatmul.mubr.msk.f32.vlgmr.msra.gmra.mrb[26].mxu1 %vm2684_vm11, %v3941_v27 }
 0xa19   : > { %4308 = vmatpush3.msra.mxu1 %v3283_v24  ;;  %4309 = vmatprep.mubr.msk.f32.mxu1 %vm4572_vm0, %v4573_v1 }
 0xa1a   : > { %4423 = vmatprep.subr.bf16.mxu1 %v4571_v0  ;;  %v3439_v0 = vld [vmem:[%s5145_s15] sm:$0xff] }
 0xa20   : > { %4310 = vmatmul.mubr.msk.f32.vlgmr.msra.gmra.mrb[26].mxu1 %vm2684_vm11, %v3946_v28 }
 0xa21   : > { %4425 = vmatpush3.bf16.msk.msra.mxu1 %vm4919_vm10, %v4574_v18  ;;  %4333 = vmatprep.mubr.msk.f32.mxu1 %vm4572_vm0, %v4573_v1  ;;  %v3440_v1 = vld [vmem:[%s5145_s15 + $0x8] sm:$0xff] }
 0xaf3   : > { %v3358_v30 = vpop.f32.mrb[26].mxu1 }
 0xaf4   : > { %v4428_v31 = vadd.f32 %v3358_v30, %v3138_v29  ;;  %v4311_v32 = vpop.f32.mrb[27].mxu1 }
 0xaf6   : > { %v3363_v33 = vmax.f32 %v4428_v31, 0.0 }
 0xaf8   : > { %4317 = vmatmul.mubr.msk.f32.vlgmr.msra.gmra.mrb[26].mxu0 %vm578_vm1, %v3363_v33  ;;  %4334 = vmatmul.mubr.msk.f32.vlgmr.msra.gmra.mrb[28].mxu1 %vm578_vm1, %v3363_v33 }
 0xaf9   : > { %4321 = vmatprep.mubr.msk.f32.mxu0 %vm2684_vm11, %v3439_v0 }
 0xbcb   : > { %v3435_v34 = vpop.f32.mrb[26].mxu0  ;;  %v3686_v18 = vpop.f32.mrb[28].mxu1 }
 0xbcc   : > { %v4318_v35 = vpop.f32.mrb[27].mxu0  ;;  %4319 = vmatprep.subr.mxu0 %v3435_v34  ;;  %v4335_v36 = vpop.f32.mrb[29].mxu1 }
 0xbcd   : > { %4320 = vmatpush3.msra.mxu0 %v3435_v34 }
 0xbce   : > { %4322 = vmatmul.mubr.msk.f32.vlgmr.msra.gmra.mrb[28].mxu0 %vm2684_vm11, %v3440_v1  ;;  %4324 = vmatprep.subr.mxu0 %v3363_v33 }
 0xbcf   : > { %4325 = vmatpush3.msra.mxu0 %v3363_v33  ;;  %4326 = vmatprep.mubr.msk.f32.mxu0 %vm2684_vm11, %v3953_v37 }
 0xbd0   : > { %4336 = vmatprep.subr.mxu0 %v3686_v18 }
 0xbd6   : > { %4327 = vmatmul.mubr.msk.f32.vlgmr.msra.gmra.mrb[28].mxu0 %vm2684_vm11, %v3954_v38 }
 0xbd7   : > { %4337 = vmatpush3.msra.mxu0 %v3686_v18  ;;  %4338 = vmatprep.mubr.msk.f32.mxu0 %vm2684_vm11, %v3960_v39 }
 0xbde   : > { %4339 = vmatmul.mubr.msk.f32.vlgmr.msra.gmra.mrb[28].mxu0 %vm2684_vm11, %v3961_v10 }
 0xcb1   : > { %v4340_v42 = vpop.f32.mrb[28].mxu0 }
 0xcb2   : > { %v4429_v43 = vadd.f32 %v4340_v42, %v3530_v41  ;;  %v3765_v13 = vpop.f32.mrb[29].mxu0 }
 0xcb3   : > { %v4430_v44 = vadd.f32 %v3765_v13, %v3525_v40 }
 0xcb4   : > { %v3777_v15 = vmax.f32 %v4429_v43, 0.0 }
 0xcb5   : > { %v3776_v45 = vmax.f32 %v4430_v44, 0.0 }
 0xcb6   : > { %v3779_v46 = vadd.f32 %v3777_v15, %v4738_v3 }
 0xcb7   : > { %v3778_v47 = vadd.f32 %v3776_v45, %v4736_v2 }
 0xcb8   : > { %3781 = vst.msk [vmem:[%s569_s0 + $0x8] sm:$0xff] %vm578_vm1, %v3779_v46 }
 0xcb9   : > { %3780 = vst.msk [vmem:[%s569_s0] sm:$0xff] %vm578_vm1, %v3778_v47 }
 0xcba   : > { %4520 = shalt.err (!%p4517_p3)
}
 0xcbb   : > { %s4521_s22 = scalar_lea.hbm %s5082_s28, 256  ;;  %s4525_s27 = scalar_lea.hbm %s5148_s18, 512 }
 0xcbc   : > { %p4522_p4 = scmp.ne.s32.totalorder %s5082_s28, %s4521_s22  ;;  %p4526_p9 = scmp.lt.u32.totalorder %s5082_s28, %s5148_s18 }
 0xcbd   : > { %p4527_p10 = scmp.lt.u32.totalorder %s4525_s27, %s4521_s22  ;;  %p4529_p12 = scmp.lt.u32.totalorder %s4521_s22, %s5082_s28 }
 0xcbe   : > { %p4523_p7 = pnand %p4522_p4, %p4715_p5 }
 0xcbf   : > { %p4528_p11 = por %p4527_p10, %p4526_p9 }
 0xcc0   : > { %p4524_p8 = pneg %p4523_p7 }
 0xcc1   : > { %p4530_p13 = por %p4529_p12, %p4528_p11 }
 0xcc3   : > { %p4531_p0 = pnand %p4530_p13, %p4524_p8 }
 0xcc5   : > { %4534 = shalt.err (!%p4531_p0)
}
 0xcc6   : > { %s4577_s1 = smov 128   ;;  %s4578_s2 = smov 8  }
 0xcc7   : > { %4451 = dma.vmem_to_hbm [thread:$0]  (%p4715_p5), %s5084_s26, 256, %s5082_s28, %s5089_s17, %s4577_s1, %s4577_s1, %s4578_s2  }
 0xcc8 PF: > { %p4457_p1 = scmp.ge.s32.totalorder %s4569_s19, 2  ;;  %s3811_s0 = sand.u32 1, %s4557_s29  }
 0xcc9   : > { %s3812_s22 = scalar_lea.sflag [#allocation4], %s3811_s0 }
 0xcca   : > { %p4454_p2 = pnand %p4457_p1, %p4719_p6 }
 0xccc   : > { %4552 = dma.done.wait (!%p4454_p2), %s3812_s22, 256  }
 0xccd   : > { %4554 = vsyncadd (!%p4454_p2), %s3812_s22, 4294967040  ;;  %s5175_s19 = sld [smem:[#allocation7_spill]]  ;;  %s5176_s20 = sld [smem:[#allocation6_spill]] }
 0xcce   : > { %s5177_s0 = sld [smem:[#allocation8_spill]]  ;;  %s5178_s29 = smov %s4561_s30 }
 0xcd3   : > { %p29_p3 = scmp.ge.s32.totalorder %s5175_s19, 4   ;;  %s5179_s30 = smov %s5176_s20 }
 0xcd5   :  { %31 = sbr.rel (!%p29_p3) target bundleno = 8 (0x8), region = 135 }
 0xcdc   :  { %3817 = vsyncpa [#allocation4], 1 }
 0xcdd   :  { %3819 = vsyncpa [#allocation4 + $0x1], 1 }

</bundles_post_ra>
